<compile_context>
chip_gen: v7x
topology: tpu7x:2x2x1
jax: 0.10.0
libtpu: 0.0.40
codegen_flags: <defaults>
</compile_context>

<pallas_src>
import jax
import jax.numpy as jnp
from jax.experimental import pallas as pl
from jax.experimental.pallas import tpu as pltpu


# ----------------------------------------------------------------------------
# Pallas kernel: fused (re-parameterised) RepBlock forward
#   y = relu( conv3x3(x, w_eq) + b_eq )
# ----------------------------------------------------------------------------
def _rep_block_kernel(x_ref, w_ref, b_ref, o_ref, xs_ref, acc_ref):
    # x_ref  : (1, H, W, TK)        unpadded NHWC input, one Cin tile (compute dtype)
    # w_ref  : (1, 3, 3*TK, TCout)  folded weights, K ordered as (kw, cin-in-tile)
    # b_ref  : (1, TCout)           folded bias (float32)
    # o_ref  : (1, H, Wr, TCout)    width-padded output tile
    # xs_ref : (H+2, Wr, 3*TK)      kw-concatenated, zero-haloed staging (scratch)
    # acc_ref: (H*Wr, TCout)        float32 accumulator (scratch)
    # grid   : (N, Cout tiles, Cin tiles) -- Cin (k) is the innermost reduction axis
    H = o_ref.shape[1]
    Wr = o_ref.shape[2]
    W = x_ref.shape[2]
    TK = x_ref.shape[3]
    K3 = xs_ref.shape[2]          # == 3 * TK
    TCout = o_ref.shape[3]
    k = pl.program_id(2)
    zdt = xs_ref.dtype

    # ---- Constant halo: zero once per reduction chain (k == 0), not every step.
    #      xs[i, w, kw*TK + c] == padded_x[i, w + kw, c]  (i: padded row, w: out col)
    @pl.when(k == 0)
    def _zero_halo():
        xs_ref[0:1, :, :] = jnp.zeros((1, Wr, K3), zdt)              # top pad row
        xs_ref[H + 1:H + 2, :, :] = jnp.zeros((1, Wr, K3), zdt)      # bottom pad row
        xs_ref[:, 0:1, 0:TK] = jnp.zeros((H + 2, 1, TK), zdt)        # left pad (kw=0)
        if W > 1:
            xs_ref[:, W - 1:W, 2 * TK:3 * TK] = jnp.zeros((H + 2, 1, TK), zdt)  # right pad (kw=2)
        if Wr > W:
            xs_ref[:, W:Wr, :] = jnp.zeros((H + 2, Wr - W, K3), zdt)  # unused cols stay 0

    # ---- Stage this Cin tile, kw-concatenated along the lane axis (every step).
    x = x_ref[0]                                                     # (H, W, TK)
    xs_ref[1:H + 1, 0:W, TK:2 * TK] = x                              # kw = 1 (centre)
    if W > 1:
        xs_ref[1:H + 1, 1:W, 0:TK] = x[:, 0:W - 1, :]                # kw = 0
        xs_ref[1:H + 1, 0:W - 1, 2 * TK:3 * TK] = x[:, 1:W, :]       # kw = 2

    # ---- 3 matmuls (one per kh), each with K = 3*TK.  The (H, Wr) -> rows merge is
    #      tile-aligned because Wr % 8 == 0.  First tap writes acc directly at k == 0
    #      (no zero-fill pass).
    # TODO(synk): on v7x, verify in the bundle dump that += lowers to MRB in-place
    # accumulation rather than per-dot VMEM RMW of the accumulator.
    @pl.when(k == 0)
    def _first_write():
        acc_ref[...] = jnp.dot(xs_ref[0:H].reshape(H * Wr, K3), w_ref[0, 0],
                               preferred_element_type=jnp.float32)

    @pl.when(k > 0)
    def _first_acc():
        acc_ref[...] += jnp.dot(xs_ref[0:H].reshape(H * Wr, K3), w_ref[0, 0],
                                preferred_element_type=jnp.float32)

    for kh in (1, 2):
        acc_ref[...] += jnp.dot(xs_ref[kh:kh + H].reshape(H * Wr, K3), w_ref[0, kh],
                                preferred_element_type=jnp.float32)

    # ---- Epilogue on the last Cin tile: bias + ReLU, full-width unmasked store.
    #      Columns [W, Wr) hold relu(bias) garbage and are cropped in the wrapper.
    @pl.when(k == pl.num_programs(2) - 1)
    def _finalize():
        y = jnp.maximum(acc_ref[...] + b_ref[...], 0.0)
        o_ref[0] = y.reshape(H, Wr, TCout).astype(o_ref.dtype)


# ----------------------------------------------------------------------------
# Wrapper helpers: tiling, re-parameterisation, VMEM budgeting
# ----------------------------------------------------------------------------
def _pick_tile(dim, target, align=128):
    """Largest lane-aligned tile <= target that divides `dim`; else the full dim."""
    if dim <= target:
        return dim
    t = (target // align) * align
    while t >= align:
        if dim % t == 0:
            return t
        t -= align
    return dim


def _choose_cout_tile(cout, n_batch):
    """256-wide RHS fills the v6e/v7x MXU; keep >=2 parallel tiles for dual-TC chips."""
    if cout % 256 == 0:
        if n_batch * (cout // 256) >= 2:
            return 256
        return 128          # N == 1 and Cout == 256: two 128-wide tiles -> 2 TCs busy
    return _pick_tile(cout, 128)


def _fold_rep_params(w3, b3, w1, b1):
    """RepVGG re-parameterisation: fold the 1x1 branch into the 3x3 centre tap."""
    w_eq = w3.astype(jnp.float32).at[:, :, 1, 1].add(
        w1.astype(jnp.float32)[:, :, 0, 0])
    b_eq = b3.astype(jnp.float32) + b1.astype(jnp.float32)
    return w_eq, b_eq


def prepare_rep_block_params(w3, b3, w1, b1, *, cin_tile=1024,
                             compute_dtype=jnp.bfloat16):
    """Hoisted (per-layer, once) weight prep: fold, transpose, K-reorder, cast.

    Returns weights shaped (nK, 3, 3*TK, Cout) where the third axis is ordered as
    (kw, cin-within-tile) so the kernel's K axis matches the staged input layout.
    """
    cout, cin = w3.shape[0], w3.shape[1]
    w_eq, b_eq = _fold_rep_params(w3, b3, w1, b1)          # OIHW, float32
    tk = _pick_tile(cin, cin_tile)
    nk = cin // tk
    w_hwio = jnp.transpose(w_eq, (2, 3, 1, 0))             # (3, 3, Cin, Cout)
    w_t = w_hwio.reshape(3, 3, nk, tk, cout)
    w_prep = jnp.transpose(w_t, (2, 0, 1, 3, 4)).reshape(nk, 3, 3 * tk, cout)
    return dict(
        w=w_prep.astype(compute_dtype),
        b=b_eq.reshape(1, cout).astype(jnp.float32),
        tk=tk, cin=cin, cout=cout, compute_dtype=compute_dtype,
    )


def _kernel_vmem_bytes(H, W, Wr, tk, tcout, compute_dtype, out_dtype):
    c = jnp.dtype(compute_dtype).itemsize
    o = jnp.dtype(out_dtype).itemsize
    x_blk = H * W * tk * c * 2                 # double-buffered input block
    w_blk = 3 * 3 * tk * tcout * c * 2         # double-buffered weight block
    b_blk = tcout * 4 * 2
    o_blk = H * Wr * tcout * o * 2             # double-buffered output block
    xs = (H + 2) * Wr * 3 * tk * c             # staging scratch
    acc = H * Wr * tcout * 4                   # f32 accumulator
    return x_blk + w_blk + b_blk + o_blk + xs + acc


# ----------------------------------------------------------------------------
# Forward wrappers
# ----------------------------------------------------------------------------
def rep_block_forward_nhwc(x_nhwc, prep, *, out_dtype=None):
    """Fused RepBlock forward on NHWC input; returns NHWC (width-cropped)."""
    N, H, W, Cin = x_nhwc.shape
    assert Cin == prep["cin"]
    Cout = prep["cout"]
    TK = prep["tk"]
    cdt = prep["compute_dtype"]
    nK = Cin // TK
    TCout = _choose_cout_tile(Cout, N)
    nJ = Cout // TCout
    Wr = ((W + 7) // 8) * 8                    # keep rows-merge / stores tile-aligned
    out_dtype = out_dtype if out_dtype is not None else x_nhwc.dtype

    needed = _kernel_vmem_bytes(H, W, Wr, TK, TCout, cdt, out_dtype)
    # Margin for Mosaic internal scratch; cap at the v7x 64 MiB per-TC VMEM ceiling.
    vmem_limit = min(max(int(needed * 1.25) + (8 << 20), 32 << 20), 64 << 20)

    # TODO(synk): for tiny template maps (H=W<=15), fold the batch dim into the
    # matmul M (block (Nb,H,W,TK) -> LHS (Nb*H*Wr, 3*TK)) to amortise MXU fill/drain.
    out_nhwc = pl.pallas_call(
        _rep_block_kernel,
        out_shape=jax.ShapeDtypeStruct((N, H, Wr, Cout), out_dtype),
        grid_spec=pltpu.PrefetchScalarGridSpec(
            num_scalar_prefetch=0,
            grid=(N, nJ, nK),                              # Cin reduction innermost
            in_specs=[
                pl.BlockSpec((1, H, W, TK), lambda n, j, k: (n, 0, 0, k)),
                pl.BlockSpec((1, 3, 3 * TK, TCout), lambda n, j, k: (k, 0, 0, j)),
                pl.BlockSpec((1, TCout), lambda n, j, k: (0, j)),
            ],
            out_specs=pl.BlockSpec((1, H, Wr, TCout), lambda n, j, k: (n, 0, 0, j)),
            scratch_shapes=[
                pltpu.VMEM((H + 2, Wr, 3 * TK), cdt),      # kw-concatenated staging
                pltpu.VMEM((H * Wr, TCout), jnp.float32),  # accumulator
            ],
        ),
        compiler_params=pltpu.CompilerParams(
            dimension_semantics=("parallel", "parallel", "arbitrary"),
            vmem_limit_bytes=vmem_limit,
        ),
    )(x_nhwc.astype(cdt), prep["w"], prep["b"])

    if Wr != W:
        out_nhwc = out_nhwc[:, :, :W, :]       # fuses with downstream transpose
    return out_nhwc


def rep_block_forward(x_nchw, prep):
    """PyTorch-facing NCHW interface."""
    # TODO(synk): keep the neck NHWC end-to-end (feed NHWC features directly) to drop
    # these two full-activation HBM transposes; they are XLA glue, not kernel work.
    x_nhwc = jnp.transpose(x_nchw, (0, 2, 3, 1))
    y = rep_block_forward_nhwc(x_nhwc, prep, out_dtype=x_nchw.dtype)
    return jnp.transpose(y, (0, 3, 1, 2))


# ----------------------------------------------------------------------------
# RepAdjustLayer / RepAdjustAll (parameter containers + glue)
# ----------------------------------------------------------------------------
def _init_rep_block_params(key, cin, cout, dtype=jnp.float32):
    k3, k1, kb3, kb1 = jax.random.split(key, 4)
    scale3 = 1.0 / jnp.sqrt(cin * 9.0)
    scale1 = 1.0 / jnp.sqrt(cin * 1.0)
    return dict(
        w3=(jax.random.normal(k3, (cout, cin, 3, 3), dtype) * scale3),
        b3=(jax.random.normal(kb3, (cout,), dtype) * 0.1),
        w1=(jax.random.normal(k1, (cout, cin, 1, 1), dtype) * scale1),
        b1=(jax.random.normal(kb1, (cout,), dtype) * 0.1),
    )


class RepAdjustLayer:
    def __init__(self, key, in_channels, out_channels, crop_z=False,
                 compute_dtype=jnp.bfloat16):
        self.params = _init_rep_block_params(key, in_channels, out_channels)
        # Weight fold / transpose / reorder / cast hoisted out of the per-frame path.
        self.prep = prepare_rep_block_params(
            self.params["w3"], self.params["b3"],
            self.params["w1"], self.params["b1"],
            compute_dtype=compute_dtype)
        self.crop_z = crop_z

    def __call__(self, x):
        x = rep_block_forward(x, self.prep)
        if x.shape[3] < 20 and self.crop_z:
            l = 4
            r = l + 7
            x = x[:, :, l:r, l:r]  # pure slicing: kept as JAX glue
        return x


class RepAdjustAll:
    def __init__(self, key, in_channels, out_channels, crop_z=False):
        self.num = len(out_channels)
        keys = jax.random.split(key, self.num)
        self.layers = [
            RepAdjustLayer(keys[i], in_channels[i], out_channels[i], crop_z)
            for i in range(self.num)
        ]

    def __call__(self, features):
        if self.num == 1:
            return self.layers[0](features)
        return [self.layers[i](features[i]) for i in range(self.num)]


# ----------------------------------------------------------------------------
# Plain-JAX references (for correctness checks of the Pallas conv)
# ----------------------------------------------------------------------------
def _ref_folded_conv(x, w3, b3, w1, b1, compute_dtype):
    """Same re-parameterised conv, same bf16 quantisation, computed by XLA."""
    w_eq, b_eq = _fold_rep_params(w3, b3, w1, b1)
    xc = x.astype(compute_dtype).astype(jnp.float32)
    wc = w_eq.astype(compute_dtype).astype(jnp.float32)
    dn = ("NCHW", "OIHW", "NCHW")
    y = jax.lax.conv_general_dilated(xc, wc, (1, 1), ((1, 1), (1, 1)),
                                     dimension_numbers=dn)
    return jnp.maximum(y + b_eq[None, :, None, None], 0.0)


def _ref_rep_block_f32(x, w3, b3, w1, b1):
    """Original two-branch float32 module semantics."""
    dn = ("NCHW", "OIHW", "NCHW")
    y3 = jax.lax.conv_general_dilated(x, w3, (1, 1), ((1, 1), (1, 1)),
                                      dimension_numbers=dn)
    y1 = jax.lax.conv_general_dilated(x, w1, (1, 1), "VALID", dimension_numbers=dn)
    y = y3 + b3[None, :, None, None] + y1 + b1[None, :, None, None]
    return jnp.maximum(y, 0.0)


if __name__ == "__main__":
    key = jax.random.PRNGKey(0)
    kp, kx0, kx1 = jax.random.split(key, 3)

    in_channels = [4, 4]
    out_channels = [8, 8]
    N = 2
    spatial = [16, 15]  # second level exercises the Wr (width-rounding / crop) path

    model = RepAdjustAll(kp, in_channels, out_channels, crop_z=False)

    features = [
        jax.random.normal(kx0, (N, in_channels[0], spatial[0], spatial[0]), jnp.float32),
        jax.random.normal(kx1, (N, in_channels[1], spatial[1], spatial[1]), jnp.float32),
    ]

    outs = model(features)
    outs = [jax.block_until_ready(o) for o in outs]

    ok = True
    for i, (x, o) in enumerate(zip(features, outs)):
        p = model.layers[i].params
        assert o.shape == (N, out_channels[i], spatial[i], spatial[i])
        # (1) strict check of the Pallas kernel against an identically quantised
        #     (bf16 inputs/weights, folded) XLA conv reference.
        ref_s = _ref_folded_conv(x, p["w3"], p["b3"], p["w1"], p["b1"], jnp.bfloat16)
        ok = ok and bool(jnp.allclose(o, ref_s, atol=2e-3, rtol=2e-3))
        # (2) semantic check against the original two-branch float32 module
        #     (tolerance covers the deliberate bf16 quantisation of x / weights).
        ref_f = _ref_rep_block_f32(x, p["w3"], p["b3"], p["w1"], p["b1"])
        ok = ok and bool(jnp.allclose(o, ref_f, atol=1e-1, rtol=1e-1))

    print("KERNEL_OK" if ok else "KERNEL_MISMATCH")
</pallas_src>

<mosaic_0001>
module attributes {stable_mosaic.version = 11 : i64} {
  func.func @_rep_block_kernel(%arg0: i32, %arg1: i32, %arg2: i32, %arg3: memref<1x16x16x4xbf16, #tpu.memory_space<vmem>>, %arg4: memref<1x3x12x8xbf16, #tpu.memory_space<vmem>>, %arg5: memref<1x8xf32, #tpu.memory_space<vmem>>, %arg6: memref<1x16x16x8xf32, #tpu.memory_space<vmem>>, %arg7: memref<18x16x12xbf16, #tpu.memory_space<vmem>>, %arg8: memref<256x8xf32, #tpu.memory_space<vmem>>) attributes {dimension_semantics = [#tpu.dimension_semantics<parallel>, #tpu.dimension_semantics<parallel>, #tpu.dimension_semantics<arbitrary>], iteration_bounds = array<i64: 2, 1, 1>, scalar_prefetch = 0 : i64, scratch_operands = 2 : i64, tpu.core_type = #tpu.core_type<tc>, window_params = [{transform_indices = @transform_0, window_bounds = array<i64: 1, 16, 16, 4>}, {transform_indices = @transform_1, window_bounds = array<i64: 1, 3, 12, 8>}, {transform_indices = @transform_2, window_bounds = array<i64: 1, 8>}, {transform_indices = @transform_3, window_bounds = array<i64: 1, 16, 16, 8>}]} {
    %c0_i32 = arith.constant 0 : i32
    %0 = arith.cmpi eq, %arg2, %c0_i32 : i32
    %1 = arith.extui %0 : i1 to i32
    %c0_i32_0 = arith.constant 0 : i32
    %2 = arith.cmpi ne, %1, %c0_i32_0 : i32
    scf.if %2 {
      %cst_38 = arith.constant 0.000000e+00 : bf16
      %35 = vector.broadcast %cst_38 : bf16 to vector<1x16x12xbf16>
      %c0_39 = arith.constant 0 : index
      %c0_40 = arith.constant 0 : index
      %c0_41 = arith.constant 0 : index
      %36 = vector.load %arg7[%c0_39, %c0_40, %c0_41] : memref<18x16x12xbf16, #tpu.memory_space<vmem>>, vector<1x16x12xbf16>
      tpu.vector_store %arg7[%c0_39, %c0_40, %c0_41], %35 {strides = array<i32>} : memref<18x16x12xbf16, #tpu.memory_space<vmem>>, vector<1x16x12xbf16>,
      %cst_42 = arith.constant 0.000000e+00 : bf16
      %37 = vector.broadcast %cst_42 : bf16 to vector<1x16x12xbf16>
      %c17 = arith.constant 17 : index
      %c0_43 = arith.constant 0 : index
      %c0_44 = arith.constant 0 : index
      %38 = vector.load %arg7[%c17, %c0_43, %c0_44] : memref<18x16x12xbf16, #tpu.memory_space<vmem>>, vector<1x16x12xbf16>
      tpu.vector_store %arg7[%c17, %c0_43, %c0_44], %37 {strides = array<i32>} : memref<18x16x12xbf16, #tpu.memory_space<vmem>>, vector<1x16x12xbf16>,
      %cst_45 = arith.constant 0.000000e+00 : bf16
      %39 = vector.broadcast %cst_45 : bf16 to vector<18x1x4xbf16>
      %c0_46 = arith.constant 0 : index
      %c0_47 = arith.constant 0 : index
      %c0_48 = arith.constant 0 : index
      %40 = vector.load %arg7[%c0_46, %c0_47, %c0_48] : memref<18x16x12xbf16, #tpu.memory_space<vmem>>, vector<18x1x4xbf16>
      tpu.vector_store %arg7[%c0_46, %c0_47, %c0_48], %39 {strides = array<i32>} : memref<18x16x12xbf16, #tpu.memory_space<vmem>>, vector<18x1x4xbf16>,
      %cst_49 = arith.constant 0.000000e+00 : bf16
      %41 = vector.broadcast %cst_49 : bf16 to vector<18x1x4xbf16>
      %c0_50 = arith.constant 0 : index
      %c15 = arith.constant 15 : index
      %c8_51 = arith.constant 8 : index
      %42 = vector.load %arg7[%c0_50, %c15, %c8_51] : memref<18x16x12xbf16, #tpu.memory_space<vmem>>, vector<18x1x4xbf16>
      tpu.vector_store %arg7[%c0_50, %c15, %c8_51], %41 {strides = array<i32>} : memref<18x16x12xbf16, #tpu.memory_space<vmem>>, vector<18x1x4xbf16>,
    } else {
    }
    %c0 = arith.constant 0 : index
    %c0_1 = arith.constant 0 : index
    %c0_2 = arith.constant 0 : index
    %c0_3 = arith.constant 0 : index
    %3 = vector.load %arg3[%c0, %c0_1, %c0_2, %c0_3] : memref<1x16x16x4xbf16, #tpu.memory_space<vmem>>, vector<1x16x16x4xbf16>
    %4 = vector.shape_cast %3 : vector<1x16x16x4xbf16> to vector<16x16x4xbf16>
    %c1 = arith.constant 1 : index
    %c0_4 = arith.constant 0 : index
    %c4 = arith.constant 4 : index
    %5 = vector.load %arg7[%c1, %c0_4, %c4] : memref<18x16x12xbf16, #tpu.memory_space<vmem>>, vector<16x16x4xbf16>
    tpu.vector_store %arg7[%c1, %c0_4, %c4], %4 {strides = array<i32>} : memref<18x16x12xbf16, #tpu.memory_space<vmem>>, vector<16x16x4xbf16>,
    %6 = vector.extract_strided_slice %4 {offsets = [0, 0, 0], sizes = [16, 15, 4], strides = [1, 1, 1]} : vector<16x16x4xbf16> to vector<16x15x4xbf16>
    %c1_5 = arith.constant 1 : index
    %c1_6 = arith.constant 1 : index
    %c0_7 = arith.constant 0 : index
    %7 = vector.load %arg7[%c1_5, %c1_6, %c0_7] : memref<18x16x12xbf16, #tpu.memory_space<vmem>>, vector<16x15x4xbf16>
    tpu.vector_store %arg7[%c1_5, %c1_6, %c0_7], %6 {strides = array<i32>} : memref<18x16x12xbf16, #tpu.memory_space<vmem>>, vector<16x15x4xbf16>,
    %8 = vector.extract_strided_slice %4 {offsets = [0, 1, 0], sizes = [16, 15, 4], strides = [1, 1, 1]} : vector<16x16x4xbf16> to vector<16x15x4xbf16>
    %c1_8 = arith.constant 1 : index
    %c0_9 = arith.constant 0 : index
    %c8 = arith.constant 8 : index
    %9 = vector.load %arg7[%c1_8, %c0_9, %c8] : memref<18x16x12xbf16, #tpu.memory_space<vmem>>, vector<16x15x4xbf16>
    tpu.vector_store %arg7[%c1_8, %c0_9, %c8], %8 {strides = array<i32>} : memref<18x16x12xbf16, #tpu.memory_space<vmem>>, vector<16x15x4xbf16>,
    %c0_i32_10 = arith.constant 0 : i32
    %10 = arith.cmpi eq, %arg2, %c0_i32_10 : i32
    %11 = arith.extui %10 : i1 to i32
    %c0_i32_11 = arith.constant 0 : i32
    %12 = arith.cmpi ne, %11, %c0_i32_11 : i32
    scf.if %12 {
      %c0_38 = arith.constant 0 : index
      %c0_39 = arith.constant 0 : index
      %c0_40 = arith.constant 0 : index
      %35 = vector.load %arg7[%c0_38, %c0_39, %c0_40] : memref<18x16x12xbf16, #tpu.memory_space<vmem>>, vector<16x16x12xbf16>
      %36 = vector.shape_cast %35 : vector<16x16x12xbf16> to vector<256x12xbf16>
      %c0_41 = arith.constant 0 : index
      %c0_42 = arith.constant 0 : index
      %c0_43 = arith.constant 0 : index
      %c0_44 = arith.constant 0 : index
      %37 = vector.load %arg4[%c0_41, %c0_42, %c0_43, %c0_44] : memref<1x3x12x8xbf16, #tpu.memory_space<vmem>>, vector<1x1x12x8xbf16>
      %38 = vector.shape_cast %37 : vector<1x1x12x8xbf16> to vector<12x8xbf16>
      %cst_45 = arith.constant dense<0.000000e+00> : vector<256x8xf32>
      %39 = tpu.matmul %36, %38, %cst_45 {dimension_numbers = #tpu.dot_dimension_numbers<[1], [0], [0], [1], [0, 0, 1, 1], [], []>} : vector<256x12xbf16>, vector<12x8xbf16>, vector<256x8xf32> -> vector<256x8xf32>
      %c0_46 = arith.constant 0 : index
      %c0_47 = arith.constant 0 : index
      %40 = vector.load %arg8[%c0_46, %c0_47] : memref<256x8xf32, #tpu.memory_space<vmem>>, vector<256x8xf32>
      tpu.vector_store %arg8[%c0_46, %c0_47], %39 {strides = array<i32>} : memref<256x8xf32, #tpu.memory_space<vmem>>, vector<256x8xf32>,
    } else {
    }
    %c0_i32_12 = arith.constant 0 : i32
    %13 = arith.cmpi sgt, %arg2, %c0_i32_12 : i32
    %14 = arith.extui %13 : i1 to i32
    %c0_i32_13 = arith.constant 0 : i32
    %15 = arith.cmpi ne, %14, %c0_i32_13 : i32
    scf.if %15 {
      %c0_38 = arith.constant 0 : index
      %c0_39 = arith.constant 0 : index
      %35 = vector.load %arg8[%c0_38, %c0_39] : memref<256x8xf32, #tpu.memory_space<vmem>>, vector<256x8xf32>
      %c0_40 = arith.constant 0 : index
      %c0_41 = arith.constant 0 : index
      %c0_42 = arith.constant 0 : index
      %36 = vector.load %arg7[%c0_40, %c0_41, %c0_42] : memref<18x16x12xbf16, #tpu.memory_space<vmem>>, vector<16x16x12xbf16>
      %37 = vector.shape_cast %36 : vector<16x16x12xbf16> to vector<256x12xbf16>
      %c0_43 = arith.constant 0 : index
      %c0_44 = arith.constant 0 : index
      %c0_45 = arith.constant 0 : index
      %c0_46 = arith.constant 0 : index
      %38 = vector.load %arg4[%c0_43, %c0_44, %c0_45, %c0_46] : memref<1x3x12x8xbf16, #tpu.memory_space<vmem>>, vector<1x1x12x8xbf16>
      %39 = vector.shape_cast %38 : vector<1x1x12x8xbf16> to vector<12x8xbf16>
      %cst_47 = arith.constant dense<0.000000e+00> : vector<256x8xf32>
      %40 = tpu.matmul %37, %39, %cst_47 {dimension_numbers = #tpu.dot_dimension_numbers<[1], [0], [0], [1], [0, 0, 1, 1], [], []>} : vector<256x12xbf16>, vector<12x8xbf16>, vector<256x8xf32> -> vector<256x8xf32>
      %41 = arith.addf %35, %40 : vector<256x8xf32>
      %c0_48 = arith.constant 0 : index
      %c0_49 = arith.constant 0 : index
      %42 = vector.load %arg8[%c0_48, %c0_49] : memref<256x8xf32, #tpu.memory_space<vmem>>, vector<256x8xf32>
      tpu.vector_store %arg8[%c0_48, %c0_49], %41 {strides = array<i32>} : memref<256x8xf32, #tpu.memory_space<vmem>>, vector<256x8xf32>,
    } else {
    }
    %c0_14 = arith.constant 0 : index
    %c0_15 = arith.constant 0 : index
    %16 = vector.load %arg8[%c0_14, %c0_15] : memref<256x8xf32, #tpu.memory_space<vmem>>, vector<256x8xf32>
    %c1_16 = arith.constant 1 : index
    %c0_17 = arith.constant 0 : index
    %c0_18 = arith.constant 0 : index
    %17 = vector.load %arg7[%c1_16, %c0_17, %c0_18] : memref<18x16x12xbf16, #tpu.memory_space<vmem>>, vector<16x16x12xbf16>
    %18 = vector.shape_cast %17 : vector<16x16x12xbf16> to vector<256x12xbf16>
    %c0_19 = arith.constant 0 : index
    %c1_20 = arith.constant 1 : index
    %c0_21 = arith.constant 0 : index
    %c0_22 = arith.constant 0 : index
    %19 = vector.load %arg4[%c0_19, %c1_20, %c0_21, %c0_22] : memref<1x3x12x8xbf16, #tpu.memory_space<vmem>>, vector<1x1x12x8xbf16>
    %20 = vector.shape_cast %19 : vector<1x1x12x8xbf16> to vector<12x8xbf16>
    %cst = arith.constant dense<0.000000e+00> : vector<256x8xf32>
    %21 = tpu.matmul %18, %20, %cst {dimension_numbers = #tpu.dot_dimension_numbers<[1], [0], [0], [1], [0, 0, 1, 1], [], []>} : vector<256x12xbf16>, vector<12x8xbf16>, vector<256x8xf32> -> vector<256x8xf32>
    %22 = arith.addf %16, %21 : vector<256x8xf32>
    %c0_23 = arith.constant 0 : index
    %c0_24 = arith.constant 0 : index
    %23 = vector.load %arg8[%c0_23, %c0_24] : memref<256x8xf32, #tpu.memory_space<vmem>>, vector<256x8xf32>
    tpu.vector_store %arg8[%c0_23, %c0_24], %22 {strides = array<i32>} : memref<256x8xf32, #tpu.memory_space<vmem>>, vector<256x8xf32>,
    %c0_25 = arith.constant 0 : index
    %c0_26 = arith.constant 0 : index
    %24 = vector.load %arg8[%c0_25, %c0_26] : memref<256x8xf32, #tpu.memory_space<vmem>>, vector<256x8xf32>
    %c2 = arith.constant 2 : index
    %c0_27 = arith.constant 0 : index
    %c0_28 = arith.constant 0 : index
    %25 = vector.load %arg7[%c2, %c0_27, %c0_28] : memref<18x16x12xbf16, #tpu.memory_space<vmem>>, vector<16x16x12xbf16>
    %26 = vector.shape_cast %25 : vector<16x16x12xbf16> to vector<256x12xbf16>
    %c0_29 = arith.constant 0 : index
    %c2_30 = arith.constant 2 : index
    %c0_31 = arith.constant 0 : index
    %c0_32 = arith.constant 0 : index
    %27 = vector.load %arg4[%c0_29, %c2_30, %c0_31, %c0_32] : memref<1x3x12x8xbf16, #tpu.memory_space<vmem>>, vector<1x1x12x8xbf16>
    %28 = vector.shape_cast %27 : vector<1x1x12x8xbf16> to vector<12x8xbf16>
    %cst_33 = arith.constant dense<0.000000e+00> : vector<256x8xf32>
    %29 = tpu.matmul %26, %28, %cst_33 {dimension_numbers = #tpu.dot_dimension_numbers<[1], [0], [0], [1], [0, 0, 1, 1], [], []>} : vector<256x12xbf16>, vector<12x8xbf16>, vector<256x8xf32> -> vector<256x8xf32>
    %30 = arith.addf %24, %29 : vector<256x8xf32>
    %c0_34 = arith.constant 0 : index
    %c0_35 = arith.constant 0 : index
    %31 = vector.load %arg8[%c0_34, %c0_35] : memref<256x8xf32, #tpu.memory_space<vmem>>, vector<256x8xf32>
    tpu.vector_store %arg8[%c0_34, %c0_35], %30 {strides = array<i32>} : memref<256x8xf32, #tpu.memory_space<vmem>>, vector<256x8xf32>,
    %c0_i32_36 = arith.constant 0 : i32
    %32 = arith.cmpi eq, %arg2, %c0_i32_36 : i32
    %33 = arith.extui %32 : i1 to i32
    %c0_i32_37 = arith.constant 0 : i32
    %34 = arith.cmpi ne, %33, %c0_i32_37 : i32
    scf.if %34 {
      %c0_38 = arith.constant 0 : index
      %c0_39 = arith.constant 0 : index
      %35 = vector.load %arg8[%c0_38, %c0_39] : memref<256x8xf32, #tpu.memory_space<vmem>>, vector<256x8xf32>
      %c0_40 = arith.constant 0 : index
      %c0_41 = arith.constant 0 : index
      %36 = vector.load %arg5[%c0_40, %c0_41] : memref<1x8xf32, #tpu.memory_space<vmem>>, vector<1x8xf32>
      %37 = vector.broadcast %36 : vector<1x8xf32> to vector<256x8xf32>
      %38 = arith.addf %35, %37 : vector<256x8xf32>
      %cst_42 = arith.constant 0.000000e+00 : f32
      %39 = vector.broadcast %cst_42 : f32 to vector<256x8xf32>
      %40 = arith.maximumf %38, %39 : vector<256x8xf32>
      %41 = vector.shape_cast %40 : vector<256x8xf32> to vector<16x16x8xf32>
      %c0_43 = arith.constant 0 : index
      %c0_44 = arith.constant 0 : index
      %c0_45 = arith.constant 0 : index
      %c0_46 = arith.constant 0 : index
      %42 = vector.load %arg6[%c0_43, %c0_44, %c0_45, %c0_46] : memref<1x16x16x8xf32, #tpu.memory_space<vmem>>, vector<1x16x16x8xf32>
      %43 = vector.shape_cast %42 : vector<1x16x16x8xf32> to vector<16x16x8xf32>
      %44 = vector.shape_cast %41 : vector<16x16x8xf32> to vector<1x16x16x8xf32>
      tpu.vector_store %arg6[%c0_43, %c0_44, %c0_45, %c0_46], %44 {strides = array<i32>} : memref<1x16x16x8xf32, #tpu.memory_space<vmem>>, vector<1x16x16x8xf32>,
    } else {
    }
    return
  }
  func.func @transform_0(%arg0: i32, %arg1: i32, %arg2: i32) -> (i32, i32, i32, i32) {
    %c0_i32 = arith.constant 0 : i32
    %c0_i32_0 = arith.constant 0 : i32
    %c0_i32_1 = arith.constant 0 : i32
    return %arg0, %c0_i32, %c0_i32_0, %arg2 : i32, i32, i32, i32
  }
  func.func @transform_1(%arg0: i32, %arg1: i32, %arg2: i32) -> (i32, i32, i32, i32) {
    %c0_i32 = arith.constant 0 : i32
    %c0_i32_0 = arith.constant 0 : i32
    %c0_i32_1 = arith.constant 0 : i32
    return %arg2, %c0_i32, %c0_i32_0, %arg1 : i32, i32, i32, i32
  }
  func.func @transform_2(%arg0: i32, %arg1: i32, %arg2: i32) -> (i32, i32) {
    %c0_i32 = arith.constant 0 : i32
    %c0_i32_0 = arith.constant 0 : i32
    return %c0_i32, %arg1 : i32, i32
  }
  func.func @transform_3(%arg0: i32, %arg1: i32, %arg2: i32) -> (i32, i32, i32, i32) {
    %c0_i32 = arith.constant 0 : i32
    %c0_i32_0 = arith.constant 0 : i32
    %c0_i32_1 = arith.constant 0 : i32
    return %arg0, %c0_i32, %c0_i32_0, %arg1 : i32, i32, i32, i32
  }
}

</mosaic_0001>

<bundles_post_ra>
// kernel: tpu_custom_call.1
= control target key start
LH: loop header
LB: loop body
LE: loop exit
PB: predicated region body
PF: predicated region fallthrough
CT: control target
= control target key end

     0   :  { %s2758_s12 = smov 0   ;;  %s2760_s13 = smov 0   ;;  %s3534_s0 = inlined_call_operand.vmem [shape: bf16[2,16,16,4], index: 0, kind: input, shape index: {}]   ;;  %s3535_s1 = inlined_call_operand.vmem [shape: bf16[1,3,12,8], index: 1, kind: input, shape index: {}]   ;;  %s3536_s2 = inlined_call_operand.vmem [shape: f32[1,8], index: 2, kind: input, shape index: {}]   ;;  %s3537_s3 = inlined_call_operand.vmem [shape: f32[2,16,16,8], index: 3, kind: output, shape index: {}]  }
   0x1   :  { %s2762_s14 = smov 0  }
   0x2 LB: > { %s32_s15 = sadd.s32 1, %s2729_s13  ;;  %p2408_p0 = scmp.ge.s32.totalorder %s2733_s14, 1  ;;  %s2733_s14 = sphi %s2762_s14, %s13_s14   ;;  %s2729_s13 = sphi %s2760_s13, %s3563_s13   ;;  %s2725_s12 = sphi %s2758_s12, %s3562_s12  }
   0x3   : > { %p34_p1 = scmp.ge.s32.totalorder %s32_s15, 2  ;;  %p186_p2 = scmp.lt.s32.totalorder %s2733_s14, 3 }
   0x5   : > { %s3565_s15 = smov (%p34_p1, %s32_s15), 0  ;;  %p187_p3 = pnand %p2408_p0, %p186_p2 }
   0x6   : > { %p227_p4 = scmp.lt.s32.totalorder (!%p187_p3), %s2725_s12, 1  ;;  %vm263_vm0 = vcmask (!%p187_p3), 24576   ;;  %vm264_vm1 = vsmask.f32 (!%p187_p3), 256  ;;  %vm320_vm2 = vcmask (!%p187_p3), 97351   ;;  %s2735_s20 = smov (!%p187_p3), 4  }
   0x7   : > { %190 = sbr.rel (%p187_p3) target bundleno = 489 (0x1e9), region = 32  ;;  %vm2776_vm3 = vmand (!%p187_p3), %vm263_vm0, %vm264_vm1  ;;  %v296_v1 = vld [vmem:[#allocation2 + $0x50] sm:$0x1] (!%p187_p3)  ;;  %vm321_vm4 = vsmask.f32 (!%p187_p3), 7966  ;;  %s2736_s21 = smov (!%p187_p3), 8  }
   0x8   : > { %v297_v2 = vsel (!%p187_p3), %vm2776_vm3, 0, %v296_v1  ;;  %vm2784_vm5 = vmand (!%p187_p3), %vm320_vm2, %vm321_vm4  ;;  %v353_v4 = vld [vmem:[#allocation2 + $0x50] sm:$0x80] (!%p187_p3)  ;;  %v290_v5 = vld [vmem:[#allocation2 + $0x40] sm:$0x1] (!%p187_p3)  ;;  %vm940_vm6 = vcmask (!%p187_p3), 1045504  }
   0x9   : > { %298 = vst [vmem:[#allocation2 + $0x50] sm:$0x1] (!%p187_p3), %v297_v2  ;;  %v354_v6 = vsel (!%p187_p3), %vm2784_vm5, 0, %v353_v4  ;;  %v291_v7 = vsel (!%p187_p3), %vm2776_vm3, 0, %v290_v5  ;;  %v347_v8 = vld [vmem:[#allocation2 + $0x40] sm:$0x80] (!%p187_p3) }
   0xa   : > { %v299_v9 = vld [vmem:[#allocation2 + $0x58] sm:$0x1] (!%p187_p3)  ;;  %355 = vst [vmem:[#allocation2 + $0x50] sm:$0x80] (!%p187_p3), %v354_v6  ;;  %292 = vst [vmem:[#allocation2 + $0x40] sm:$0x1] (!%p187_p3), %v291_v7 }
   0xb   : > { %v348_v10 = vsel (!%p187_p3), %vm2784_vm5, 0, %v347_v8  ;;  %v300_v11 = vsel (!%p187_p3), %vm2776_vm3, 0, %v299_v9  ;;  %v356_v12 = vld [vmem:[#allocation2 + $0x58] sm:$0x80] (!%p187_p3)  ;;  %v293_v14 = vld [vmem:[#allocation2 + $0x48] sm:$0x1] (!%p187_p3) }
   0xc   : > { %349 = vst [vmem:[#allocation2 + $0x40] sm:$0x80] (!%p187_p3), %v348_v10  ;;  %301 = vst [vmem:[#allocation2 + $0x58] sm:$0x1] (!%p187_p3), %v300_v11  ;;  %v357_v13 = vsel (!%p187_p3), %vm2784_vm5, 0, %v356_v12  ;;  %v294_v17 = vsel (!%p187_p3), %vm2776_vm3, 0, %v293_v14 }
   0xd   : > { %v350_v15 = vld [vmem:[#allocation2 + $0x48] sm:$0x80] (!%p187_p3)  ;;  %358 = vst [vmem:[#allocation2 + $0x58] sm:$0x80] (!%p187_p3), %v357_v13  ;;  %295 = vst [vmem:[#allocation2 + $0x48] sm:$0x1] (!%p187_p3), %v294_v17 }
   0xe   : > { %s3567_s12 = smov (!%p227_p4, %s2725_s12), 1  ;;  %v351_v19 = vsel %vm2784_vm5, 0, %v350_v15  ;;  %vm259_vm7 = vcmask 97280   ;;  %vm538_vm8 = vcmask 64544   ;;  %vm683_vm9 = vcmask 31744  }
   0xf   : > { %s2504_s16 = sshll.u32 %s3567_s12, 7  ;;  %352 = vst [vmem:[#allocation2 + $0x48] sm:$0x80] %v351_v19  ;;  %vm684_vm10 = vsmask.f32 7938  ;;  %vm814_vm11 = vcmask 97344  }
  0x10   : > { %s2800_s19 = scalar_lea.vmem %s3534_s0, %s2504_s16  ;;  %vm815_vm12 = vsmask.f32 7424  ;;  %vm3132_vm13 = vmand %vm683_vm9, %vm684_vm10  ;;  %vm1105_vm15 = vcmask 64512   ;;  %s2505_s30 = sshll.u32 %s3567_s12, 8 }
  0x11   : > { %v2805_v16 = vld [vmem:[%s2800_s19 + $0x48] sm:$0xff]   ;;  %v2693_v18 = vld [vmem:[%s2800_s19 + $0x38] sm:$0xff]   ;;  %v2815_v20 = vld [vmem:[%s2800_s19 + $0x50] sm:$0xff]   ;;  %s3381_s6 = scalar_lea.vmem %s3537_s3, %s2505_s30 }
  0x12   : > { %507 = vrot.lane.b32.xlu1 %v2805_v16, %s2735_s20  ;;  %503 = vrot.lane.b32.xlu0 %v2693_v18, %s2735_s20  ;;  %v2695_v21 = vld [vmem:[%s2800_s19 + $0x40] sm:$0xff]   ;;  %v605_v22 = vshrl.u32 %v2693_v18, 16  ;;  %v608_v23 = vshll.u32 %v2693_v18, 16  ;;  %v619_v24 = vshrl.u32 %v2805_v16, 16  ;;  %v2821_v25 = vld [vmem:[%s2800_s19 + $0x58] sm:$0xff]   ;;  %v622_v36 = vshll.u32 %v2805_v16, 16  ;;  %vm3137_vm14 = vmand %vm814_vm11, %vm815_vm12 }
  0x13   : > { %v2826_v27 = vld [vmem:[%s2800_s19] sm:$0xff]   ;;  %v612_v30 = vshrl.u32 %v2695_v21, 16  ;;  %v615_v31 = vshll.u32 %v2695_v21, 16  ;;  %v626_v39 = vshrl.u32 %v2815_v20, 16  ;;  %v629_v42 = vshll.u32 %v2815_v20, 16  ;;  %v2848_v45 = vld [vmem:[%s2800_s19 + $0x8] sm:$0xff]  }
  0x14   : > { %v607_v26 = vrot.slane %v605_v22, 7  ;;  %v748_v28 = vrot.slane %v608_v23, 1  ;;  %v621_v32 = vrot.slane %v619_v24, 7  ;;  %v2837_v37 = vld [vmem:[%s2800_s19 + $0x60] sm:$0xff]   ;;  %v556_v43 = vshrl.u32 %v2826_v27, 16  ;;  %v2863_v53 = vld [vmem:[%s2800_s19 + $0x10] sm:$0xff]  }
  0x15   : > { %v614_v33 = vrot.slane %v612_v30, 7  ;;  %v750_v35 = vrot.slane %v615_v31, 1  ;;  %v628_v41 = vrot.slane %v626_v39, 7  ;;  %v559_v46 = vshll.u32 %v2826_v27, 16  ;;  %v2873_v58 = vld [vmem:[%s2800_s19 + $0x68] sm:$0xff]   ;;  %v2880_v61 = vld [vmem:[%s2800_s19 + $0x70] sm:$0xff]  }
  0x16   : > { %509 = vrot.lane.b32.xlu1 %v2815_v20, %s2735_s20  ;;  %505 = vrot.lane.b32.xlu0 %v2695_v21, %s2735_s20  ;;  %v2829_v29 = vor.u32 %v608_v23, %v607_v26  ;;  %v749_v34 = vor.u32 %v748_v28, %v605_v22  ;;  %v2842_v40 = vor.u32 %v622_v36, %v621_v32  ;;  %v633_v47 = vshrl.u32 %v2821_v25, 16  ;;  %v2890_v6 = vld [vmem:[%s2800_s19 + $0x18] sm:$0xff]   ;;  %v2908_v14 = vld [vmem:[%s2800_s19 + $0x20] sm:$0xff]  }
  0x17   : > { %v2839_v38 = vor.u32 %v615_v31, %v614_v33  ;;  %v751_v44 = vor.u32 %v750_v35, %v612_v30  ;;  %v2854_v48 = vor.u32 %v629_v42, %v628_v41  ;;  %v558_v49 = vrot.slane %v556_v43, 7  ;;  %v2919_v20 = vld [vmem:[%s2800_s19 + $0x28] sm:$0xff]   ;;  %v2926_v22 = vld [vmem:[%s2800_s19 + $0x30] sm:$0xff]  }
  0x18   : > { %v640_v50 = vshrl.u32 %v2837_v37, 16  ;;  %v635_v51 = vrot.slane %v633_v47, 7  ;;  %v636_v52 = vshll.u32 %v2821_v25, 16  ;;  %v643_v56 = vshll.u32 %v2837_v37, 16 }
  0x19   : > { %v2865_v54 = vor.u32 %v559_v46, %v558_v49  ;;  %v563_v57 = vshrl.u32 %v2848_v45, 16  ;;  %v752_v59 = vrot.slane %v622_v36, 1  ;;  %v566_v1 = vshll.u32 %v2848_v45, 16 }
  0x1a   : > { %511 = vrot.lane.b32.xlu1 %v2821_v25, %s2735_s20  ;;  %489 = vrot.lane.b32.xlu0 %v2826_v27, %s2735_s20  ;;  %v642_v55 = vrot.slane %v640_v50, 7  ;;  %v2875_v60 = vor.u32 %v636_v52, %v635_v51  ;;  %v570_v2 = vshrl.u32 %v2863_v53, 16  ;;  %v754_v4 = vrot.slane %v629_v42, 1  ;;  %v2951_v42 = vld [vmem:[%s2800_s19 + $0x78] sm:$0xff]   ;;  %v269_v51 = vld [vmem:[#allocation2 + $0x8] sm:$0x1] }
  0x1b   : > { %v565_v63 = vrot.slane %v563_v57, 7  ;;  %v647_v5 = vshrl.u32 %v2873_v58, 16  ;;  %v573_v9 = vshll.u32 %v2863_v53, 16  ;;  %v654_v10 = vshrl.u32 %v2880_v61, 16 }
  0x1c   : > { %v2882_v62 = vor.u32 %v643_v56, %v642_v55  ;;  %v572_v8 = vrot.slane %v570_v2, 7  ;;  %v753_v11 = vor.u32 %v752_v59, %v619_v24  ;;  %v650_v13 = vshll.u32 %v2873_v58, 16 }
  0x1d   : > { %v2894_v7 = vor.u32 %v566_v1, %v565_v63  ;;  %v649_v12 = vrot.slane %v647_v5, 7  ;;  %v656_v16 = vrot.slane %v654_v10, 7  ;;  %v657_v17 = vshll.u32 %v2880_v61, 16 }
  0x1e   : > { %780 = vrot.lane.b32.xlu1 %v749_v34, %s2736_s21  ;;  %513 = vrot.lane.b32.xlu0 %v2837_v37, %s2735_s20  ;;  %v2912_v15 = vor.u32 %v573_v9, %v572_v8  ;;  %v3540_v18 = vshrl.u32 %v2890_v6, 16  ;;  %v755_v19 = vor.u32 %v754_v4, %v626_v39  ;;  %v3545_v26 = vshll.u32 %v2890_v6, 16  ;;  %v302_v34 = vld [vmem:[#allocation2 + $0x60] sm:$0x1]  ;;  %v305_v4 = vld [vmem:[#allocation2 + $0x68] sm:$0x1] }
  0x1f   : > { %v2923_v21 = vor.u32 %v650_v13, %v649_v12  ;;  %v2930_v23 = vor.u32 %v657_v17, %v656_v16  ;;  %v3542_v28 = vshrl.u32 %v2908_v14, 16  ;;  %v734_v30 = vrot.slane %v559_v46, 1  ;;  %v362_v8 = vld [vmem:[#allocation2 + $0x68] sm:$0x80] }
  0x20   : > { %v579_v24 = vrot.slane %v3540_v18, 7  ;;  %v756_v31 = vrot.slane %v636_v52, 1  ;;  %v2937_v32 = vrot.slane %v643_v56, 1  ;;  %v3538_v33 = vshrl.u32 %v2919_v20, 16  ;;  %v326_v52 = vld [vmem:[#allocation2 + $0x8] sm:$0x80] }
  0x21   : > { %v586_v36 = vrot.slane %v3542_v28, 7  ;;  %v587_v39 = vshll.u32 %v2908_v14, 16  ;;  %v3539_v41 = vshrl.u32 %v2926_v22, 16  ;;  %v3541_v49 = vshll.u32 %v2919_v20, 16 }
  0x22   : > { %782 = vrot.lane.b32.xlu1 %v751_v44, %s2736_s21  ;;  %491 = vrot.lane.b32.xlu0 %v2848_v45, %s2735_s20  ;;  %v2944_v35 = vor.u32 %v3545_v26, %v579_v24  ;;  %v359_v44 = vld [vmem:[#allocation2 + $0x60] sm:$0x80]  ;;  %v593_v46 = vrot.slane %v3538_v33, 7  ;;  %v3544_v59 = vshll.u32 %v2926_v22, 16  ;;  %v3543_v63 = vshrl.u32 %v2951_v42, 16 }
  0x23   : > { %v2958_v55 = vor.u32 %v587_v39, %v586_v36  ;;  %v600_v56 = vrot.slane %v3539_v41, 7  ;;  %v735_v12 = vor.u32 %v734_v30, %v556_v43  ;;  %v329_v24 = vld [vmem:[#allocation2 + $0x10] sm:$0x80]  ;;  %v308_v36 = vld [vmem:[#allocation2 + $0x70] sm:$0x1]  ;;  %v664_v27 = vshll.u32 %v2951_v42, 16 }
  0x24   : > { %v2969_v16 = vor.u32 %v3541_v49, %v593_v46  ;;  %v365_v33 = vld [vmem:[#allocation2 + $0x70] sm:$0x80]  ;;  %v275_v41 = vld [vmem:[#allocation2 + $0x18] sm:$0x1]  ;;  %v303_v43 = vsel %vm2776_vm3, 0, %v302_v34  ;;  %v2984_v49 = vrot.slane %v566_v1, 1  ;;  %v757_v34 = vor.u32 %v756_v31, %v633_v47 }
  0x25   : > { %v2975_v18 = vor.u32 %v3544_v59, %v600_v56  ;;  %v332_v30 = vld [vmem:[#allocation2 + $0x18] sm:$0x80]  ;;  %v311_v46 = vld [vmem:[#allocation2 + $0x78] sm:$0x1]  ;;  %304 = vst [vmem:[#allocation2 + $0x60] sm:$0x1] %v303_v43 }
  0x26   : > { %515 = vrot.lane.b32.xlu1 %v2873_v58, %s2735_s20  ;;  %493 = vrot.lane.b32.xlu0 %v2863_v53, %s2735_s20  ;;  %v360_v28 = vsel %vm2784_vm5, 0, %v359_v44  ;;  %v270_v56 = vsel %vm2776_vm3, 0, %v269_v51  ;;  %v368_v59 = vld [vmem:[#allocation2 + $0x78] sm:$0x80]  ;;  %v2708_v1 = vld [vmem:[%s3535_s1] sm:$0x3f]  }
  0x27   : > { %361 = vst [vmem:[#allocation2 + $0x60] sm:$0x80] %v360_v28  ;;  %271 = vst [vmem:[#allocation2 + $0x8] sm:$0x1] %v270_v56  ;;  %v278_v44 = vld [vmem:[#allocation2 + $0x20] sm:$0x1]  ;;  %2662 = vmatprep.subr.msk.bf16.mxu1 %vm940_vm6, %v2708_v1  ;;  %2661 = vmatprep.subr.msk.bf16.mxu0 %vm940_vm6, %v2708_v1  ;;  %v759_v56 = vor.u32 %v2937_v32, %v640_v50 }
  0x28   : > { %v335_v51 = vld [vmem:[#allocation2 + $0x20] sm:$0x80]  ;;  %v306_v25 = vsel %vm2776_vm3, 0, %v305_v4  ;;  %v363_v47 = vsel %vm2784_vm5, 0, %v362_v8  ;;  %v281_v31 = vld [vmem:[#allocation2 + $0x28] sm:$0x1] }
  0x29   : > { %307 = vst [vmem:[#allocation2 + $0x68] sm:$0x1] %v306_v25  ;;  %364 = vst [vmem:[#allocation2 + $0x68] sm:$0x80] %v363_v47  ;;  %v366_v4 = vsel %vm2784_vm5, 0, %v365_v33  ;;  %v276_v8 = vsel %vm2776_vm3, 0, %v275_v41 }
  0x2a   : > { %784 = vrot.lane.b32.xlu1 %v753_v11, %s2736_s21  ;;  %517 = vrot.lane.b32.xlu0 %v2880_v61, %s2735_s20  ;;  %v272_v11 = vld [vmem:[#allocation2 + $0x10] sm:$0x1]  ;;  %367 = vst [vmem:[#allocation2 + $0x70] sm:$0x80] %v366_v4  ;;  %277 = vst [vmem:[#allocation2 + $0x18] sm:$0x1] %v276_v8 }
  0x2b   : > { %v273_v28 = vsel %vm2776_vm3, 0, %v272_v11  ;;  %v338_v11 = vld [vmem:[#allocation2 + $0x28] sm:$0x80]  ;;  %v942_v33 = vsel %vm940_vm6, %v2708_v1, 0  ;;  %v279_v41 = vsel %vm2776_vm3, 0, %v278_v44  ;;  %v2737_v32 = vmov 0  }
  0x2c   : > { %274 = vst [vmem:[#allocation2 + $0x10] sm:$0x1] %v273_v28  ;;  %2660 = vmatpush3.bf16.msra.mxu1 %v942_v33  ;;  %280 = vst [vmem:[#allocation2 + $0x20] sm:$0x1] %v279_v41  ;;  %v339_v43 = vsel %vm2784_vm5, 0, %v338_v11  ;;  %2558 = vmatpush3.bf16.msra.mxu0 %v942_v33  ;;  %v760_v4 = vrot.slane %v650_v13, 1 }
  0x2d   : > { %340 = vst [vmem:[#allocation2 + $0x28] sm:$0x80] %v339_v43  ;;  %v341_v44 = vld [vmem:[#allocation2 + $0x30] sm:$0x80]  ;;  %v344_v50 = vld [vmem:[#allocation2 + $0x38] sm:$0x80] }
  0x2e   : > { %786 = vrot.lane.b32.xlu1 %v755_v19, %s2736_s21  ;;  %495 = vrot.lane.b32.xlu0 %v2890_v6, %s2735_s20  ;;  %v663_v19 = vrot.slane %v3543_v63, 7  ;;  %v327_v63 = vsel %vm2784_vm5, 0, %v326_v52  ;;  %v738_v52 = vrot.slane %v573_v9, 1  ;;  %v309_v9 = vsel %vm2776_vm3, 0, %v308_v36  ;;  %260 = vst.msk [vmem:[#allocation2] sm:$0xff] %vm259_vm7, %v2737_v32  ;;  %262 = vst.msk [vmem:[#allocation2 + $0x88] sm:$0xff] %vm259_vm7, %v2737_v32 }
  0x2f   : > { %328 = vst [vmem:[#allocation2 + $0x8] sm:$0x80] %v327_v63  ;;  %v330_v63 = vsel %vm2784_vm5, 0, %v329_v24  ;;  %310 = vst [vmem:[#allocation2 + $0x70] sm:$0x1] %v309_v9  ;;  %v312_v24 = vsel %vm2776_vm3, 0, %v311_v46  ;;  %v737_v9 = vor.u32 %v2984_v49, %v563_v57  ;;  %v761_v45 = vor.u32 %v760_v4, %v647_v5 }
  0x30   : > { %v2996_v26 = vor.u32 %v664_v27, %v663_v19  ;;  %331 = vst [vmem:[#allocation2 + $0x10] sm:$0x80] %v330_v63  ;;  %v369_v36 = vsel %vm2784_vm5, 0, %v368_v59  ;;  %313 = vst [vmem:[#allocation2 + $0x78] sm:$0x1] %v312_v24  ;;  %v336_v19 = vsel %vm2784_vm5, 0, %v335_v51  ;;  %v739_v28 = vor.u32 %v738_v52, %v570_v2 }
  0x31   : > { %370 = vst [vmem:[#allocation2 + $0x78] sm:$0x80] %v369_v36  ;;  %337 = vst [vmem:[#allocation2 + $0x20] sm:$0x80] %v336_v19  ;;  %v282_v59 = vsel %vm2776_vm3, 0, %v281_v31  ;;  %v342_v25 = vsel %vm2784_vm5, 0, %v341_v44 }
  0x32   : > { %766 = vrot.lane.b32.xlu1 %v735_v12, %s2736_s21  ;;  %497 = vrot.lane.b32.xlu0 %v2908_v14, %s2735_s20  ;;  %v333_v12 = vsel %vm2784_vm5, 0, %v332_v30  ;;  %v2709_v30 = vld [vmem:[%s3535_s1 + $0x8] sm:$0x3f]   ;;  %v284_v46 = vld [vmem:[#allocation2 + $0x30] sm:$0x1]  ;;  %v345_v47 = vsel %vm2784_vm5, 0, %v344_v50 }
  0x33   : > { %334 = vst [vmem:[#allocation2 + $0x18] sm:$0x80] %v333_v12  ;;  %283 = vst [vmem:[#allocation2 + $0x28] sm:$0x1] %v282_v59  ;;  %v285_v1 = vsel %vm2776_vm3, 0, %v284_v46  ;;  %2663 = vmatprep.subr.msk.bf16.mxu1 %vm940_vm6, %v2709_v30  ;;  %v762_v31 = vrot.slane %v657_v17, 1 }
  0x34   : > { %v287_v51 = vld [vmem:[#allocation2 + $0x38] sm:$0x1]  ;;  %286 = vst [vmem:[#allocation2 + $0x30] sm:$0x1] %v285_v1  ;;  %343 = vst [vmem:[#allocation2 + $0x30] sm:$0x80] %v342_v25 }
  0x35   : > { %v288_v37 = vsel %vm2776_vm3, 0, %v287_v51  ;;  %346 = vst [vmem:[#allocation2 + $0x38] sm:$0x80] %v345_v47  ;;  %v2710_v63 = vld [vmem:[%s3535_s1 + $0x10] sm:$0x3f]   ;;  %v763_v2 = vor.u32 %v762_v31, %v654_v10  ;;  %v742_v17 = vrot.slane %v587_v39, 1 }
  0x36   : > { %499 = vrot.lane.b32.xlu1 %v2919_v20, %s2735_s20  ;;  %788 = vrot.lane.b32.xlu0 %v757_v34, %s2736_s21  ;;  %v3052_v34 = vsel %vm940_vm6, %v2709_v30, 0  ;;  %289 = vst [vmem:[#allocation2 + $0x38] sm:$0x1] %v288_v37  ;;  %v3077_v53 = vsel %vm940_vm6, %v2710_v63, 0  ;;  %v3550_v57 = vshll.u32 %v2890_v6, 16  ;;  %v3551_v10 = vshrl.u32 %v2908_v14, 16 }
  0x37   : > { %2664 = vmatprep.subr.msk.bf16.mxu0 %vm940_vm6, %v2710_v63  ;;  %v266_v49 = vld [vmem:[#allocation2] sm:$0x1]  ;;  %v323_v52 = vld [vmem:[#allocation2] sm:$0x80]  ;;  %v3552_v58 = vshll.u32 %v2926_v22, 16  ;;  %v3553_v11 = vshrl.u32 %v2890_v6, 16 }
  0x38   : > { %v740_v13 = vrot.slane %v3550_v57, 1  ;;  %v267_v8 = vsel %vm2776_vm3, 0, %v266_v49  ;;  %v324_v61 = vsel %vm2784_vm5, 0, %v323_v52  ;;  %v743_v39 = vor.u32 %v742_v17, %v3551_v10  ;;  %v374_v1 = vld [vmem:[#allocation2 + $0x88] sm:$0x80] }
  0x39   : > { %268 = vst [vmem:[#allocation2] sm:$0x1] %v267_v8  ;;  %325 = vst [vmem:[#allocation2] sm:$0x80] %v324_v61  ;;  %v746_v5 = vrot.slane %v3552_v58, 1  ;;  %v3554_v24 = vshll.u32 %v2919_v20, 16 }
  0x3a   : > { %501 = vrot.lane.b32.xlu1 %v2926_v22, %s2735_s20  ;;  %790 = vrot.lane.b32.xlu0 %v759_v56, %s2736_s21  ;;  %v741_v12 = vor.u32 %v740_v13, %v3553_v11  ;;  %v3555_v33 = vshrl.u32 %v2926_v22, 16  ;;  %v764_v14 = vrot.slane %v664_v27, 1  ;;  %v3556_v19 = vshrl.u32 %v2919_v20, 16  ;;  %v314_v22 = vld [vmem:[#allocation2 + $0x80] sm:$0x1] }
  0x3b   : > { %v744_v36 = vrot.slane %v3554_v24, 1  ;;  %v3557_v6 = vshrl.u32 %v2951_v42, 16  ;;  %v371_v27 = vld [vmem:[#allocation2 + $0x80] sm:$0x80]  ;;  %v315_v20 = vsel %vm2776_vm3, 0, %v314_v22  ;;  %v375_v51 = vsel %vm2784_vm5, 0, %v374_v1 }
  0x3c   : > { %v747_v41 = vor.u32 %v746_v5, %v3555_v33  ;;  %v372_v46 = vsel %vm2784_vm5, 0, %v371_v27  ;;  %316 = vst [vmem:[#allocation2 + $0x80] sm:$0x1] %v315_v20  ;;  %v317_v56 = vld [vmem:[#allocation2 + $0x88] sm:$0x1] }
  0x3d   : > { %v745_v59 = vor.u32 %v744_v36, %v3556_v19  ;;  %v765_v30 = vor.u32 %v764_v14, %v3557_v6  ;;  %373 = vst [vmem:[#allocation2 + $0x80] sm:$0x80] %v372_v46  ;;  %v318_v44 = vsel %vm2776_vm3, 0, %v317_v56  ;;  %376 = vst [vmem:[#allocation2 + $0x88] sm:$0x80] %v375_v51 }
  0x3e   : > { %770 = vrot.lane.b32.xlu1 %v739_v28, %s2736_s21  ;;  %768 = vrot.lane.b32.xlu0 %v737_v9, %s2736_s21  ;;  %319 = vst [vmem:[#allocation2 + $0x88] sm:$0x1] %v318_v44 }
  0x40   : > { %v868_v43 = vld [vmem:[#allocation2] sm:$0xff] }
  0x41   : > { %2559 = vmatprep.mubr.msk.bf16.mxu0 %vm259_vm7, %v868_v43 }
  0x42   : > { %794 = vrot.lane.b32.xlu1 %v763_v2, %s2736_s21  ;;  %792 = vrot.lane.b32.xlu0 %v761_v45, %s2736_s21 }
  0x46   : > { %774 = vrot.lane.b32.xlu1 %v743_v39, %s2736_s21  ;;  %772 = vrot.lane.b32.xlu0 %v741_v12, %s2736_s21 }
  0x4a   : > { %778 = vrot.lane.b32.xlu1 %v747_v41, %s2736_s21  ;;  %776 = vrot.lane.b32.xlu0 %v745_v59, %s2736_s21 }
  0x4e   : > { %796 = vrot.lane.b32.xlu1 %v765_v30, %s2736_s21  ;;  %519 = vrot.lane.b32.xlu0 %v2951_v42, %s2735_s20 }
  0x84   : > { %v508_v42 = vpop.permute.xlu1 %507  ;;  %v504_v25 = vpop.permute.xlu0 %503 }
  0x85   : > { %548 = vst.msk [vmem:[#allocation2 + $0x50] sm:$0xff] %vm538_vm8, %v508_v42  ;;  %546 = vst.msk [vmem:[#allocation2 + $0x40] sm:$0xff] %vm538_vm8, %v504_v25 }
  0x88   : > { %v510_v37 = vpop.permute.xlu1 %509  ;;  %v506_v50 = vpop.permute.xlu0 %505 }
  0x89   : > { %549 = vst.msk [vmem:[#allocation2 + $0x58] sm:$0xff] %vm538_vm8, %v510_v37  ;;  %547 = vst.msk [vmem:[#allocation2 + $0x48] sm:$0xff] %vm538_vm8, %v506_v50 }
  0x8c   : > { %v512_v0 = vpop.permute.xlu1 %511  ;;  %v490_v3 = vpop.permute.xlu0 %489  ;;  %v707_v47 = vld [vmem:[#allocation2 + $0x40] sm:$0xff] }
  0x8d   : > { %550 = vst.msk [vmem:[#allocation2 + $0x60] sm:$0xff] %vm538_vm8, %v512_v0  ;;  %539 = vst.msk [vmem:[#allocation2 + $0x8] sm:$0xff] %vm538_vm8, %v490_v3  ;;  %v708_v63 = vsel %vm3132_vm13, %v2829_v29, %v707_v47 }
  0x90   : > { %v781_v31 = vpop.permute.xlu1 %780  ;;  %v514_v4 = vpop.permute.xlu0 %513  ;;  %v710_v2 = vld [vmem:[#allocation2 + $0x48] sm:$0xff]  ;;  %v716_v39 = vld [vmem:[#allocation2 + $0x58] sm:$0xff] }
  0x91   : > { %v3146_v9 = vsel %vm3137_vm14, %v781_v31, %v708_v63  ;;  %551 = vst.msk [vmem:[#allocation2 + $0x68] sm:$0xff] %vm538_vm8, %v514_v4  ;;  %v711_v17 = vsel %vm3132_vm13, %v2839_v38, %v710_v2  ;;  %v713_v38 = vld [vmem:[#allocation2 + $0x50] sm:$0xff] }
  0x92   : > { %840 = vst [vmem:[#allocation2 + $0x40] sm:$0xff] %v3146_v9  ;;  %2575 = vmatprep.mubr.msk.bf16.mxu1 %vm259_vm7, %v3146_v9  ;;  %v714_v52 = vsel %vm3132_vm13, %v2842_v40, %v713_v38 }
  0x94   : > { %v783_v45 = vpop.permute.xlu1 %782  ;;  %v492_v57 = vpop.permute.xlu0 %491  ;;  %v686_v11 = vld [vmem:[#allocation2 + $0x8] sm:$0xff]  ;;  %v719_v33 = vld [vmem:[#allocation2 + $0x60] sm:$0xff] }
  0x95   : > { %v3157_v29 = vsel %vm3137_vm14, %v783_v45, %v711_v17  ;;  %540 = vst.msk [vmem:[#allocation2 + $0x10] sm:$0xff] %vm538_vm8, %v492_v57  ;;  %v687_v24 = vsel %vm3132_vm13, %v2865_v54, %v686_v11  ;;  %v720_v14 = vsel %vm3132_vm13, %v2875_v60, %v719_v33 }
  0x96   : > { %843 = vst [vmem:[#allocation2 + $0x48] sm:$0xff] %v3157_v29  ;;  %2576 = vmatmul.mubr.msk.bf16.vlgmr.msra.gmra.mrb[0].mxu1 %vm259_vm7, %v3157_v29 }
  0x97   : > { %2592 = vmatpush3.bf16.msra.mxu1 %v3052_v34  ;;  %v717_v34 = vsel %vm3132_vm13, %v2854_v48, %v716_v39 }
  0x98   : > { %v516_v13 = vpop.permute.xlu1 %515  ;;  %v494_v49 = vpop.permute.xlu0 %493  ;;  %v722_v59 = vld [vmem:[#allocation2 + $0x68] sm:$0xff] }
  0x99   : > { %552 = vst.msk [vmem:[#allocation2 + $0x70] sm:$0xff] %vm538_vm8, %v516_v13  ;;  %541 = vst.msk [vmem:[#allocation2 + $0x18] sm:$0xff] %vm538_vm8, %v494_v49 }
  0x9c   : > { %v785_v8 = vpop.permute.xlu1 %784  ;;  %v518_v10 = vpop.permute.xlu0 %517  ;;  %v689_v22 = vld [vmem:[#allocation2 + $0x10] sm:$0xff] }
  0x9d   : > { %v3171_v61 = vsel %vm3137_vm14, %v785_v8, %v714_v52  ;;  %553 = vst.msk [vmem:[#allocation2 + $0x78] sm:$0xff] %vm538_vm8, %v518_v10 }
  0x9e   : > { %846 = vst [vmem:[#allocation2 + $0x50] sm:$0xff] %v3171_v61  ;;  %2579 = vmatprep.mubr.msk.bf16.mxu1 %vm259_vm7, %v3171_v61 }
  0xa0   : > { %v787_v58 = vpop.permute.xlu1 %786  ;;  %v496_v5 = vpop.permute.xlu0 %495  ;;  %v692_v60 = vld [vmem:[#allocation2 + $0x18] sm:$0xff]  ;;  %v725_v51 = vld [vmem:[#allocation2 + $0x70] sm:$0xff] }
  0xa1   : > { %v3182_v40 = vsel %vm3137_vm14, %v787_v58, %v717_v34  ;;  %542 = vst.msk [vmem:[#allocation2 + $0x20] sm:$0xff] %vm538_vm8, %v496_v5  ;;  %v693_v27 = vsel %vm3132_vm13, %v2912_v15, %v692_v60 }
  0xa2   : > { %849 = vst [vmem:[#allocation2 + $0x58] sm:$0xff] %v3182_v40  ;;  %2580 = vmatmul.mubr.msk.bf16.gmra.mrb[4].mxu1 %vm259_vm7, %v3182_v40 }
  0xa4   : > { %v767_v12 = vpop.permute.xlu1 %766  ;;  %v498_v48 = vpop.permute.xlu0 %497  ;;  %v728_v1 = vld [vmem:[#allocation2 + $0x78] sm:$0xff] }
  0xa5   : > { %v818_v36 = vsel %vm3137_vm14, %v767_v12, %v687_v24  ;;  %543 = vst.msk [vmem:[#allocation2 + $0x28] sm:$0xff] %vm538_vm8, %v498_v48  ;;  %v729_v15 = vsel %vm3132_vm13, %v2930_v23, %v728_v1 }
  0xa6   : > { %819 = vst [vmem:[#allocation2 + $0x8] sm:$0xff] %v818_v36  ;;  %2560 = vmatmul.mubr.msk.bf16.vlgmr.msra.gmra.mrb[0].mxu0 %vm259_vm7, %v818_v36 }
  0xa7   : > { %2626 = vmatpush3.bf16.msra.mxu0 %v3077_v53  ;;  %v723_v53 = vsel %vm3132_vm13, %v2882_v62, %v722_v59  ;;  %v690_v62 = vsel %vm3132_vm13, %v2894_v7, %v689_v22  ;;  %v726_v7 = vsel %vm3132_vm13, %v2923_v21, %v725_v51 }
  0xa8   : > { %v500_v41 = vpop.permute.xlu1 %499  ;;  %v789_v19 = vpop.permute.xlu0 %788  ;;  %v695_v3 = vld [vmem:[#allocation2 + $0x20] sm:$0xff] }
  0xa9   : > { %544 = vst.msk [vmem:[#allocation2 + $0x30] sm:$0xff] %vm538_vm8, %v500_v41  ;;  %v3202_v54 = vsel %vm3137_vm14, %v789_v19, %v720_v14  ;;  %v696_v47 = vsel %vm3132_vm13, %v2944_v35, %v695_v3 }
  0xaa   : > { %852 = vst [vmem:[#allocation2 + $0x60] sm:$0xff] %v3202_v54  ;;  %2583 = vmatprep.mubr.msk.bf16.mxu1 %vm259_vm7, %v3202_v54 }
  0xac   : > { %v502_v43 = vpop.permute.xlu1 %501  ;;  %v791_v6 = vpop.permute.xlu0 %790  ;;  %v698_v50 = vld [vmem:[#allocation2 + $0x28] sm:$0xff] }
  0xad   : > { %545 = vst.msk [vmem:[#allocation2 + $0x38] sm:$0xff] %vm538_vm8, %v502_v43  ;;  %v3213_v30 = vsel %vm3137_vm14, %v791_v6, %v723_v53  ;;  %v699_v23 = vsel %vm3132_vm13, %v2958_v55, %v698_v50 }
  0xae   : > { %855 = vst [vmem:[#allocation2 + $0x68] sm:$0xff] %v3213_v30  ;;  %2584 = vmatmul.mubr.msk.bf16.gmra.mrb[8].mxu1 %vm259_vm7, %v3213_v30 }
  0xb0   : > { %v771_v20 = vpop.permute.xlu1 %770  ;;  %v769_v46 = vpop.permute.xlu0 %768  ;;  %v701_v55 = vld [vmem:[#allocation2 + $0x30] sm:$0xff] }
  0xb1   : > { %v824_v56 = vsel %vm3137_vm14, %v771_v20, %v693_v27  ;;  %v821_v44 = vsel %vm3137_vm14, %v769_v46, %v690_v62  ;;  %v702_v57 = vsel %vm3132_vm13, %v2969_v16, %v701_v55 }
  0xb2   : > { %825 = vst [vmem:[#allocation2 + $0x18] sm:$0xff] %v824_v56  ;;  %822 = vst [vmem:[#allocation2 + $0x10] sm:$0xff] %v821_v44  ;;  %2563 = vmatprep.mubr.msk.bf16.mxu0 %vm259_vm7, %v821_v44 }
  0xb3   : > { %2564 = vmatmul.mubr.msk.bf16.gmra.mrb[4].mxu0 %vm259_vm7, %v824_v56 }
  0xb4   : > { %v795_v42 = vpop.permute.xlu1 %794  ;;  %v793_v25 = vpop.permute.xlu0 %792  ;;  %v704_v4 = vld [vmem:[#allocation2 + $0x38] sm:$0xff] }
  0xb5   : > { %v3238_v37 = vsel %vm3137_vm14, %v795_v42, %v729_v15  ;;  %v857_v0 = vsel %vm3137_vm14, %v793_v25, %v726_v7  ;;  %v705_v17 = vsel %vm3132_vm13, %v2975_v18, %v704_v4 }
  0xb6   : > { %861 = vst [vmem:[#allocation2 + $0x78] sm:$0xff] %v3238_v37  ;;  %858 = vst [vmem:[#allocation2 + $0x70] sm:$0xff] %v857_v0  ;;  %2587 = vmatprep.mubr.msk.bf16.mxu1 %vm259_vm7, %v857_v0 }
  0xb7   : > { %2588 = vmatmul.mubr.msk.bf16.gmra.mrb[12].mxu1 %vm259_vm7, %v3238_v37 }
  0xb8   : > { %v775_v21 = vpop.permute.xlu1 %774  ;;  %v773_v31 = vpop.permute.xlu0 %772  ;;  %2593 = vmatprep.mubr.msk.bf16.mxu1 %vm259_vm7, %v818_v36 }
  0xb9   : > { %v830_v63 = vsel %vm3137_vm14, %v775_v21, %v699_v23  ;;  %v827_v2 = vsel %vm3137_vm14, %v773_v31, %v696_v47 }
  0xba   : > { %831 = vst [vmem:[#allocation2 + $0x28] sm:$0xff] %v830_v63  ;;  %828 = vst [vmem:[#allocation2 + $0x20] sm:$0xff] %v827_v2  ;;  %2567 = vmatprep.mubr.msk.bf16.mxu0 %vm259_vm7, %v827_v2 }
  0xbb   : > { %2568 = vmatmul.mubr.msk.bf16.gmra.mrb[8].mxu0 %vm259_vm7, %v830_v63 }
  0xbc   : > { %v779_v35 = vpop.permute.xlu1 %778  ;;  %v777_v45 = vpop.permute.xlu0 %776 }
  0xbd   : > { %v836_v13 = vsel %vm3137_vm14, %v779_v35, %v705_v17  ;;  %v833_v49 = vsel %vm3137_vm14, %v777_v45, %v702_v57 }
  0xbe   : > { %837 = vst [vmem:[#allocation2 + $0x38] sm:$0xff] %v836_v13  ;;  %834 = vst [vmem:[#allocation2 + $0x30] sm:$0xff] %v833_v49  ;;  %2571 = vmatprep.mubr.msk.bf16.mxu0 %vm259_vm7, %v833_v49 }
  0xbf   : > { %2594 = vmatmul.mubr.msk.bf16.vlgmr.msra.gmra.mrb[16].mxu1 %vm259_vm7, %v821_v44 }
  0xc0   : > { %2597 = vmatprep.mubr.msk.bf16.mxu1 %vm259_vm7, %v824_v56  ;;  %v520_v18 = vpop.permute.xlu0 %519  ;;  %v797_v16 = vpop.permute.xlu1 %796 }
  0xc1   : > { %554 = vst.msk [vmem:[#allocation2 + $0x80] sm:$0xff] %vm538_vm8, %v520_v18 }
  0xc3   : > { %2572 = vmatmul.mubr.msk.bf16.gmra.mrb[12].mxu0 %vm259_vm7, %v836_v13 }
  0xc4   : > { %2627 = vmatprep.mubr.msk.bf16.mxu0 %vm259_vm7, %v821_v44 }
  0xc7   : > { %2598 = vmatmul.mubr.msk.bf16.gmra.mrb[20].mxu1 %vm259_vm7, %v827_v2 }
  0xc8   : > { %2601 = vmatprep.mubr.msk.bf16.mxu1 %vm259_vm7, %v830_v63  ;;  %v731_v38 = vld [vmem:[#allocation2 + $0x80] sm:$0xff] }
  0xc9   : > { %v732_v52 = vsel %vm3132_vm13, %v2996_v26, %v731_v38  ;;  %v1859_v26 = vld [vmem:[#allocation2 + $0x88] sm:$0xff] }
  0xca   : > { %v863_v8 = vsel %vm3137_vm14, %v797_v16, %v732_v52 }
  0xcb   : > { %2628 = vmatmul.mubr.msk.bf16.vlgmr.msra.gmra.mrb[16].mxu0 %vm259_vm7, %v824_v56  ;;  %864 = vst [vmem:[#allocation2 + $0x80] sm:$0xff] %v863_v8 }
  0xcc   : > { %2631 = vmatprep.mubr.msk.bf16.mxu0 %vm259_vm7, %v827_v2 }
  0xcf   : > { %2602 = vmatmul.mubr.msk.bf16.gmra.mrb[24].mxu1 %vm259_vm7, %v833_v49 }
  0xd0   : > { %2605 = vmatprep.mubr.msk.bf16.mxu1 %vm259_vm7, %v836_v13 }
  0xd3   : > { %2632 = vmatmul.mubr.msk.bf16.gmra.mrb[20].mxu0 %vm259_vm7, %v830_v63 }
  0xd4   : > { %2635 = vmatprep.mubr.msk.bf16.mxu0 %vm259_vm7, %v833_v49 }
  0xd7   : > { %2606 = vmatmul.mubr.msk.bf16.gmra.mrb[28].mxu1 %vm259_vm7, %v3146_v9 }
  0xd8   : > { %2609 = vmatprep.mubr.msk.bf16.mxu1 %vm259_vm7, %v3157_v29 }
  0xdb   : > { %2636 = vmatmul.mubr.msk.bf16.gmra.mrb[24].mxu0 %vm259_vm7, %v836_v13 }
  0xdc   : > { %2639 = vmatprep.mubr.msk.bf16.mxu0 %vm259_vm7, %v3146_v9 }
  0xdf   : > { %2610 = vmatmul.mubr.msk.bf16.gmra.mrb[32].mxu1 %vm259_vm7, %v3171_v61 }
  0xe0   : > { %2613 = vmatprep.mubr.msk.bf16.mxu1 %vm259_vm7, %v3182_v40 }
  0xe3   : > { %2640 = vmatmul.mubr.msk.bf16.gmra.mrb[28].mxu0 %vm259_vm7, %v3157_v29 }
  0xe4   : > { %2643 = vmatprep.mubr.msk.bf16.mxu0 %vm259_vm7, %v3171_v61 }
  0xe7   : > { %2614 = vmatmul.mubr.msk.bf16.gmra.mrb[36].mxu1 %vm259_vm7, %v3202_v54 }
  0xe8   : > { %2617 = vmatprep.mubr.msk.bf16.mxu1 %vm259_vm7, %v3213_v30 }
  0xeb   : > { %2644 = vmatmul.mubr.msk.bf16.gmra.mrb[32].mxu0 %vm259_vm7, %v3182_v40 }
  0xec   : > { %2647 = vmatprep.mubr.msk.bf16.mxu0 %vm259_vm7, %v3202_v54 }
  0xef   : > { %2618 = vmatmul.mubr.msk.bf16.gmra.mrb[40].mxu1 %vm259_vm7, %v857_v0 }
  0xf0   : > { %2621 = vmatprep.mubr.msk.bf16.mxu1 %vm259_vm7, %v3238_v37 }
  0xf3   : > { %2648 = vmatmul.mubr.msk.bf16.gmra.mrb[36].mxu0 %vm259_vm7, %v3213_v30 }
  0xf4   : > { %2651 = vmatprep.mubr.msk.bf16.mxu0 %vm259_vm7, %v857_v0 }
  0xf7   : > { %2622 = vmatmul.mubr.msk.bf16.gmra.mrb[44].mxu1 %vm259_vm7, %v863_v8 }
  0xfb   : > { %2652 = vmatmul.mubr.msk.bf16.gmra.mrb[40].mxu0 %vm259_vm7, %v3238_v37 }
  0xfc   : > { %2655 = vmatprep.mubr.msk.bf16.mxu0 %vm259_vm7, %v863_v8 }
 0x103   : > { %2656 = vmatmul.mubr.msk.bf16.gmra.mrb[44].mxu0 %vm259_vm7, %v1859_v26 }
 0x169   : > { %v2577_v32 = vpop.f32.mrb[0].mxu1 }
 0x16a   : > { %1124 = vst.msk [vmem:[#allocation3 + $0x90] sm:$0xff] %vm1105_vm15, %v2577_v32  ;;  %v1042_v28 = vpop.f32.mrb[1].mxu1 }
 0x16b   : > { %1122 = vst.msk [vmem:[#allocation3 + $0x80] sm:$0xff] %vm1105_vm15, %v1042_v28  ;;  %v2578_v9 = vpop.f32.mrb[2].mxu1 }
 0x16c   : > { %1125 = vst.msk [vmem:[#allocation3 + $0x98] sm:$0xff] %vm1105_vm15, %v2578_v9  ;;  %v1045_v29 = vpop.f32.mrb[3].mxu1 }
 0x16d   : > { %1123 = vst.msk [vmem:[#allocation3 + $0x88] sm:$0xff] %vm1105_vm15, %v1045_v29 }
 0x175   : > { %v2581_v61 = vpop.f32.mrb[4].mxu1 }
 0x176   : > { %1128 = vst.msk [vmem:[#allocation3 + $0xb0] sm:$0xff] %vm1105_vm15, %v2581_v61  ;;  %v1058_v10 = vpop.f32.mrb[5].mxu1 }
 0x177   : > { %1126 = vst.msk [vmem:[#allocation3 + $0xa0] sm:$0xff] %vm1105_vm15, %v1058_v10  ;;  %v2582_v39 = vpop.f32.mrb[6].mxu1 }
 0x178   : > { %1129 = vst.msk [vmem:[#allocation3 + $0xb8] sm:$0xff] %vm1105_vm15, %v2582_v39  ;;  %v1061_v34 = vpop.f32.mrb[7].mxu1 }
 0x179   : > { %v2561_v58 = vpop.f32.mrb[0].mxu0  ;;  %1127 = vst.msk [vmem:[#allocation3 + $0xa8] sm:$0xff] %vm1105_vm15, %v1061_v34 }
 0x17a   : > { %1108 = vst.msk [vmem:[#allocation3 + $0x10] sm:$0xff] %vm1105_vm15, %v2561_v58  ;;  %v978_v40 = vpop.f32.mrb[1].mxu0 }
 0x17b   : > { %1106 = vst.msk [vmem:[#allocation3] sm:$0xff] %vm1105_vm15, %v978_v40  ;;  %v2562_v5 = vpop.f32.mrb[2].mxu0 }
 0x17c   : > { %1109 = vst.msk [vmem:[#allocation3 + $0x18] sm:$0xff] %vm1105_vm15, %v2562_v5  ;;  %v981_v11 = vpop.f32.mrb[3].mxu0 }
 0x17d   : > { %1107 = vst.msk [vmem:[#allocation3 + $0x8] sm:$0xff] %vm1105_vm15, %v981_v11 }
 0x181   : > { %v2585_v12 = vpop.f32.mrb[8].mxu1  ;;  %v1478_v27 = vld [vmem:[#allocation3 + $0x10] sm:$0xff] }
 0x182   : > { %1132 = vst.msk [vmem:[#allocation3 + $0xd0] sm:$0xff] %vm1105_vm15, %v2585_v12  ;;  %v1074_v24 = vpop.f32.mrb[9].mxu1  ;;  %v1476_v46 = vld [vmem:[#allocation3] sm:$0xff] }
 0x183   : > { %1130 = vst.msk [vmem:[#allocation3 + $0xc0] sm:$0xff] %vm1105_vm15, %v1074_v24  ;;  %v2586_v48 = vpop.f32.mrb[10].mxu1  ;;  %v1479_v44 = vld [vmem:[#allocation3 + $0x18] sm:$0xff] }
 0x184   : > { %1133 = vst.msk [vmem:[#allocation3 + $0xd8] sm:$0xff] %vm1105_vm15, %v2586_v48  ;;  %v1077_v36 = vpop.f32.mrb[11].mxu1  ;;  %v1477_v42 = vld [vmem:[#allocation3 + $0x8] sm:$0xff] }
 0x185   : > { %1131 = vst.msk [vmem:[#allocation3 + $0xc8] sm:$0xff] %vm1105_vm15, %v1077_v36  ;;  %v3370_v36 = vld [vmem:[%s3536_s2] ss:$0 sm:$0xff] }
 0x186   : > { %v2565_v33 = vpop.f32.mrb[4].mxu0 }
 0x187   : > { %1112 = vst.msk [vmem:[#allocation3 + $0x30] sm:$0xff] %vm1105_vm15, %v2565_v33  ;;  %v994_v41 = vpop.f32.mrb[5].mxu0 }
 0x188   : > { %1110 = vst.msk [vmem:[#allocation3 + $0x20] sm:$0xff] %vm1105_vm15, %v994_v41  ;;  %v2566_v14 = vpop.f32.mrb[6].mxu0 }
 0x189   : > { %1113 = vst.msk [vmem:[#allocation3 + $0x38] sm:$0xff] %vm1105_vm15, %v2566_v14  ;;  %v997_v19 = vpop.f32.mrb[7].mxu0 }
 0x18a   : > { %1111 = vst.msk [vmem:[#allocation3 + $0x28] sm:$0xff] %vm1105_vm15, %v997_v19  ;;  %v2589_v54 = vpop.f32.mrb[12].mxu1 }
 0x18b   : > { %1136 = vst.msk [vmem:[#allocation3 + $0xf0] sm:$0xff] %vm1105_vm15, %v2589_v54  ;;  %v1090_v59 = vpop.f32.mrb[13].mxu1 }
 0x18c   : > { %1134 = vst.msk [vmem:[#allocation3 + $0xe0] sm:$0xff] %vm1105_vm15, %v1090_v59  ;;  %v2590_v43 = vpop.f32.mrb[14].mxu1 }
 0x18d   : > { %1137 = vst.msk [vmem:[#allocation3 + $0xf8] sm:$0xff] %vm1105_vm15, %v2590_v43  ;;  %v1093_v53 = vpop.f32.mrb[15].mxu1 }
 0x18e   : > { %1135 = vst.msk [vmem:[#allocation3 + $0xe8] sm:$0xff] %vm1105_vm15, %v1093_v53  ;;  %v2569_v6 = vpop.f32.mrb[8].mxu0  ;;  %v1482_v23 = vld [vmem:[#allocation3 + $0x30] sm:$0xff] }
 0x18f   : > { %1116 = vst.msk [vmem:[#allocation3 + $0x50] sm:$0xff] %vm1105_vm15, %v2569_v6  ;;  %v1010_v60 = vpop.f32.mrb[9].mxu0  ;;  %v1480_v31 = vld [vmem:[#allocation3 + $0x20] sm:$0xff] }
 0x190   : > { %1114 = vst.msk [vmem:[#allocation3 + $0x40] sm:$0xff] %vm1105_vm15, %v1010_v60  ;;  %v2570_v30 = vpop.f32.mrb[10].mxu0  ;;  %v1483_v2 = vld [vmem:[#allocation3 + $0x38] sm:$0xff] }
 0x191   : > { %1117 = vst.msk [vmem:[#allocation3 + $0x58] sm:$0xff] %vm1105_vm15, %v2570_v30  ;;  %v1013_v22 = vpop.f32.mrb[11].mxu0  ;;  %v1481_v35 = vld [vmem:[#allocation3 + $0x28] sm:$0xff] }
 0x192   : > { %1115 = vst.msk [vmem:[#allocation3 + $0x48] sm:$0xff] %vm1105_vm15, %v1013_v22  ;;  %v2595_v20 = vpop.f32.mrb[16].mxu1 }
 0x193   : > { %v1748_v62 = vadd.f32 %v2595_v20, %v1478_v27  ;;  %v1619_v56 = vpop.f32.mrb[17].mxu1 }
 0x194   : > { %v1746_v1 = vadd.f32 %v1619_v56, %v1476_v46  ;;  %v2596_v51 = vpop.f32.mrb[18].mxu1 }
 0x195   : > { %1781 = vst.msk [vmem:[#allocation3 + $0x10] sm:$0xff] %vm1105_vm15, %v1748_v62  ;;  %v1749_v15 = vadd.f32 %v2596_v51, %v1479_v44  ;;  %v1622_v7 = vpop.f32.mrb[19].mxu1 }
 0x196   : > { %1779 = vst.msk [vmem:[#allocation3] sm:$0xff] %vm1105_vm15, %v1746_v1  ;;  %v1747_v25 = vadd.f32 %v1622_v7, %v1477_v42  ;;  %v2573_v37 = vpop.f32.mrb[12].mxu0  ;;  %v1486_v61 = vld [vmem:[#allocation3 + $0x50] sm:$0xff] }
 0x197   : > { %1782 = vst.msk [vmem:[#allocation3 + $0x18] sm:$0xff] %vm1105_vm15, %v1749_v15  ;;  %1120 = vst.msk [vmem:[#allocation3 + $0x70] sm:$0xff] %vm1105_vm15, %v2573_v37  ;;  %v1026_v50 = vpop.f32.mrb[13].mxu0  ;;  %v1484_v34 = vld [vmem:[#allocation3 + $0x40] sm:$0xff] }
 0x198   : > { %1780 = vst.msk [vmem:[#allocation3 + $0x8] sm:$0xff] %vm1105_vm15, %v1747_v25  ;;  %1118 = vst.msk [vmem:[#allocation3 + $0x60] sm:$0xff] %vm1105_vm15, %v1026_v50  ;;  %v2574_v0 = vpop.f32.mrb[14].mxu0  ;;  %v1487_v5 = vld [vmem:[#allocation3 + $0x58] sm:$0xff] }
 0x199   : > { %1121 = vst.msk [vmem:[#allocation3 + $0x78] sm:$0xff] %vm1105_vm15, %v2574_v0  ;;  %v1029_v3 = vpop.f32.mrb[15].mxu0  ;;  %v1485_v24 = vld [vmem:[#allocation3 + $0x48] sm:$0xff] }
 0x19a   : > { %1119 = vst.msk [vmem:[#allocation3 + $0x68] sm:$0xff] %vm1105_vm15, %v1029_v3  ;;  %v2599_v21 = vpop.f32.mrb[20].mxu1 }
 0x19b   : > { %v1752_v47 = vadd.f32 %v2599_v21, %v1482_v23  ;;  %v1635_v63 = vpop.f32.mrb[21].mxu1 }
 0x19c   : > { %v1750_v4 = vadd.f32 %v1635_v63, %v1480_v31  ;;  %v2600_v55 = vpop.f32.mrb[22].mxu1  ;;  %v1813_v13 = vld [vmem:[#allocation3 + $0x10] sm:$0xff] }
 0x19d   : > { %1785 = vst.msk [vmem:[#allocation3 + $0x30] sm:$0xff] %vm1105_vm15, %v1752_v47  ;;  %v1753_v17 = vadd.f32 %v2600_v55, %v1483_v2  ;;  %v1638_v45 = vpop.f32.mrb[23].mxu1  ;;  %v1811_v16 = vld [vmem:[#allocation3] sm:$0xff] }
 0x19e   : > { %1783 = vst.msk [vmem:[#allocation3 + $0x20] sm:$0xff] %vm1105_vm15, %v1750_v4  ;;  %v1751_v57 = vadd.f32 %v1638_v45, %v1481_v35  ;;  %v2629_v49 = vpop.f32.mrb[16].mxu0  ;;  %v1814_v8 = vld [vmem:[#allocation3 + $0x18] sm:$0xff]  ;;  %v1490_v44 = vld [vmem:[#allocation3 + $0x70] sm:$0xff] }
 0x19f   : > { %1786 = vst.msk [vmem:[#allocation3 + $0x38] sm:$0xff] %vm1105_vm15, %v1753_v17  ;;  %v2082_v18 = vadd.f32 %v2629_v49, %v1813_v13  ;;  %v1953_v38 = vpop.f32.mrb[17].mxu0  ;;  %v1812_v28 = vld [vmem:[#allocation3 + $0x8] sm:$0xff]  ;;  %v1488_v37 = vld [vmem:[#allocation3 + $0x60] sm:$0xff] }
 0x1a0   : > { %1784 = vst.msk [vmem:[#allocation3 + $0x28] sm:$0xff] %vm1105_vm15, %v1751_v57  ;;  %v2080_v52 = vadd.f32 %v1953_v38, %v1811_v16  ;;  %v2630_v26 = vpop.f32.mrb[18].mxu0  ;;  %v1491_v21 = vld [vmem:[#allocation3 + $0x78] sm:$0xff] }
 0x1a1   : > { %2114 = vst.msk [vmem:[#allocation3 + $0x10] sm:$0xff] %vm1105_vm15, %v2082_v18  ;;  %v2083_v32 = vadd.f32 %v2630_v26, %v1814_v8  ;;  %v1956_v9 = vpop.f32.mrb[19].mxu0  ;;  %v1489_v4 = vld [vmem:[#allocation3 + $0x68] sm:$0xff] }
 0x1a2   : > { %2112 = vst.msk [vmem:[#allocation3] sm:$0xff] %vm1105_vm15, %v2080_v52  ;;  %v2081_v29 = vadd.f32 %v1956_v9, %v1812_v28  ;;  %v2603_v10 = vpop.f32.mrb[24].mxu1 }
 0x1a3   : > { %2115 = vst.msk [vmem:[#allocation3 + $0x18] sm:$0xff] %vm1105_vm15, %v2083_v32  ;;  %v1756_v39 = vadd.f32 %v2603_v10, %v1486_v61  ;;  %v1651_v58 = vpop.f32.mrb[25].mxu1 }
 0x1a4   : > { %2113 = vst.msk [vmem:[#allocation3 + $0x8] sm:$0xff] %vm1105_vm15, %v2081_v29  ;;  %v1754_v40 = vadd.f32 %v1651_v58, %v1484_v34  ;;  %v2604_v11 = vpop.f32.mrb[26].mxu1  ;;  %v1817_v41 = vld [vmem:[#allocation3 + $0x30] sm:$0xff] }
 0x1a5   : > { %1789 = vst.msk [vmem:[#allocation3 + $0x50] sm:$0xff] %vm1105_vm15, %v1756_v39  ;;  %v1757_v12 = vadd.f32 %v2604_v11, %v1487_v5  ;;  %v1654_v48 = vpop.f32.mrb[27].mxu1  ;;  %v1815_v54 = vld [vmem:[#allocation3 + $0x20] sm:$0xff]  ;;  %v1494_v39 = vld [vmem:[#allocation3 + $0x90] sm:$0xff] }
 0x1a6   : > { %1787 = vst.msk [vmem:[#allocation3 + $0x40] sm:$0xff] %vm1105_vm15, %v1754_v40  ;;  %v1755_v33 = vadd.f32 %v1654_v48, %v1485_v24  ;;  %v2633_v14 = vpop.f32.mrb[20].mxu0  ;;  %v1818_v6 = vld [vmem:[#allocation3 + $0x38] sm:$0xff] }
 0x1a7   : > { %1790 = vst.msk [vmem:[#allocation3 + $0x58] sm:$0xff] %vm1105_vm15, %v1757_v12  ;;  %v2086_v19 = vadd.f32 %v2633_v14, %v1817_v41  ;;  %v1969_v59 = vpop.f32.mrb[21].mxu0  ;;  %v1816_v20 = vld [vmem:[#allocation3 + $0x28] sm:$0xff]  ;;  %v1492_v12 = vld [vmem:[#allocation3 + $0x80] sm:$0xff]  ;;  %v1495_v14 = vld [vmem:[#allocation3 + $0x98] sm:$0xff] }
 0x1a8   : > { %v2149_v43 = vld [vmem:[#allocation3 + $0x10] sm:$0xff]  ;;  %1788 = vst.msk [vmem:[#allocation3 + $0x48] sm:$0xff] %vm1105_vm15, %v1755_v33  ;;  %v2084_v53 = vadd.f32 %v1969_v59, %v1815_v54  ;;  %v2634_v60 = vpop.f32.mrb[22].mxu0 }
 0x1a9   : > { %v2188_v30 = vadd.f32 %v3370_v36, %v2149_v43  ;;  %v2147_v22 = vld [vmem:[#allocation3] sm:$0xff]  ;;  %2118 = vst.msk [vmem:[#allocation3 + $0x30] sm:$0xff] %vm1105_vm15, %v2086_v19  ;;  %v2087_v27 = vadd.f32 %v2634_v60, %v1818_v6  ;;  %v1972_v62 = vpop.f32.mrb[23].mxu0  ;;  %v1493_v43 = vld [vmem:[#allocation3 + $0x88] sm:$0xff] }
 0x1aa   : > { %v2186_v46 = vadd.f32 %v3370_v36, %v2147_v22  ;;  %v2150_v56 = vld [vmem:[#allocation3 + $0x18] sm:$0xff]  ;;  %2116 = vst.msk [vmem:[#allocation3 + $0x20] sm:$0xff] %vm1105_vm15, %v2084_v53  ;;  %v2085_v1 = vadd.f32 %v1972_v62, %v1816_v20  ;;  %v2607_v51 = vpop.f32.mrb[28].mxu1 }
 0x1ab   : > { %v2220_v15 = vmax.f32 %v2188_v30, 0.0  ;;  %v2189_v42 = vadd.f32 %v3370_v36, %v2150_v56  ;;  %v2148_v7 = vld [vmem:[#allocation3 + $0x8] sm:$0xff]  ;;  %2119 = vst.msk [vmem:[#allocation3 + $0x38] sm:$0xff] %vm1105_vm15, %v2087_v27  ;;  %v1760_v25 = vadd.f32 %v2607_v51, %v1490_v44  ;;  %v1667_v50 = vpop.f32.mrb[29].mxu1 }
 0x1ac   : > { %v2218_v0 = vmax.f32 %v2186_v46, 0.0  ;;  %v2187_v3 = vadd.f32 %v3370_v36, %v2148_v7  ;;  %2117 = vst.msk [vmem:[#allocation3 + $0x28] sm:$0xff] %vm1105_vm15, %v2085_v1  ;;  %v1758_v23 = vadd.f32 %v1667_v50, %v1488_v37  ;;  %v2608_v47 = vpop.f32.mrb[30].mxu1  ;;  %v1821_v35 = vld [vmem:[#allocation3 + $0x50] sm:$0xff] }
 0x1ad   : > { %2252 = vst.msk [vmem:[%s3381_s6 + $0x10] sm:$0xff] %vm1105_vm15, %v2220_v15  ;;  %v2221_v31 = vmax.f32 %v2189_v42, 0.0  ;;  %1793 = vst.msk [vmem:[#allocation3 + $0x70] sm:$0xff] %vm1105_vm15, %v1760_v25  ;;  %v1761_v63 = vadd.f32 %v2608_v47, %v1491_v21  ;;  %v1670_v2 = vpop.f32.mrb[31].mxu1  ;;  %v1819_v13 = vld [vmem:[#allocation3 + $0x40] sm:$0xff] }
 0x1ae   : > { %2250 = vst.msk [vmem:[%s3381_s6] sm:$0xff] %vm1105_vm15, %v2218_v0  ;;  %v2219_v55 = vmax.f32 %v2187_v3, 0.0  ;;  %1791 = vst.msk [vmem:[#allocation3 + $0x60] sm:$0xff] %vm1105_vm15, %v1758_v23  ;;  %v1759_v17 = vadd.f32 %v1670_v2, %v1489_v4  ;;  %v2637_v45 = vpop.f32.mrb[24].mxu0  ;;  %v1822_v38 = vld [vmem:[#allocation3 + $0x58] sm:$0xff]  ;;  %v1498_v3 = vld [vmem:[#allocation3 + $0xb0] sm:$0xff] }
 0x1af   : > { %2253 = vst.msk [vmem:[%s3381_s6 + $0x18] sm:$0xff] %vm1105_vm15, %v2221_v31  ;;  %1794 = vst.msk [vmem:[#allocation3 + $0x78] sm:$0xff] %vm1105_vm15, %v1761_v63  ;;  %v2090_v57 = vadd.f32 %v2637_v45, %v1821_v35  ;;  %v1985_v49 = vpop.f32.mrb[25].mxu0  ;;  %v1820_v28 = vld [vmem:[#allocation3 + $0x48] sm:$0xff]  ;;  %v1496_v4 = vld [vmem:[#allocation3 + $0xa0] sm:$0xff] }
 0x1b0   : > { %2251 = vst.msk [vmem:[%s3381_s6 + $0x8] sm:$0xff] %vm1105_vm15, %v2219_v55  ;;  %v2153_v18 = vld [vmem:[#allocation3 + $0x30] sm:$0xff]  ;;  %1792 = vst.msk [vmem:[#allocation3 + $0x68] sm:$0xff] %vm1105_vm15, %v1759_v17  ;;  %v2088_v16 = vadd.f32 %v1985_v49, %v1819_v13  ;;  %v2638_v52 = vpop.f32.mrb[26].mxu0  ;;  %v1499_v45 = vld [vmem:[#allocation3 + $0xb8] sm:$0xff] }
 0x1b1   : > { %v2192_v8 = vadd.f32 %v3370_v36, %v2153_v18  ;;  %v2151_v26 = vld [vmem:[#allocation3 + $0x20] sm:$0xff]  ;;  %2122 = vst.msk [vmem:[#allocation3 + $0x50] sm:$0xff] %vm1105_vm15, %v2090_v57  ;;  %v2091_v32 = vadd.f32 %v2638_v52, %v1822_v38  ;;  %v1988_v9 = vpop.f32.mrb[27].mxu0  ;;  %v1497_v18 = vld [vmem:[#allocation3 + $0xa8] sm:$0xff] }
 0x1b2   : > { %v2190_v29 = vadd.f32 %v3370_v36, %v2151_v26  ;;  %v2154_v61 = vld [vmem:[#allocation3 + $0x38] sm:$0xff]  ;;  %2120 = vst.msk [vmem:[#allocation3 + $0x40] sm:$0xff] %vm1105_vm15, %v2088_v16  ;;  %v2089_v10 = vadd.f32 %v1988_v9, %v1820_v28  ;;  %v2611_v34 = vpop.f32.mrb[32].mxu1 }
 0x1b3   : > { %v2224_v58 = vmax.f32 %v2192_v8, 0.0  ;;  %v2193_v40 = vadd.f32 %v3370_v36, %v2154_v61  ;;  %v2152_v5 = vld [vmem:[#allocation3 + $0x28] sm:$0xff]  ;;  %2123 = vst.msk [vmem:[#allocation3 + $0x58] sm:$0xff] %vm1105_vm15, %v2091_v32  ;;  %v1764_v11 = vadd.f32 %v2611_v34, %v1494_v39  ;;  %v1683_v24 = vpop.f32.mrb[33].mxu1 }
 0x1b4   : > { %v2222_v48 = vmax.f32 %v2190_v29, 0.0  ;;  %v2191_v33 = vadd.f32 %v3370_v36, %v2152_v5  ;;  %2121 = vst.msk [vmem:[#allocation3 + $0x48] sm:$0xff] %vm1105_vm15, %v2089_v10  ;;  %v1762_v41 = vadd.f32 %v1683_v24, %v1492_v12  ;;  %v2612_v19 = vpop.f32.mrb[34].mxu1  ;;  %v1825_v30 = vld [vmem:[#allocation3 + $0x70] sm:$0xff] }
 0x1b5   : > { %2256 = vst.msk [vmem:[%s3381_s6 + $0x30] sm:$0xff] %vm1105_vm15, %v2224_v58  ;;  %v2225_v54 = vmax.f32 %v2193_v40, 0.0  ;;  %1797 = vst.msk [vmem:[#allocation3 + $0x90] sm:$0xff] %vm1105_vm15, %v1764_v11  ;;  %v1765_v59 = vadd.f32 %v2612_v19, %v1495_v14  ;;  %v1686_v53 = vpop.f32.mrb[35].mxu1  ;;  %v1823_v20 = vld [vmem:[#allocation3 + $0x60] sm:$0xff] }
 0x1b6   : > { %2254 = vst.msk [vmem:[%s3381_s6 + $0x20] sm:$0xff] %vm1105_vm15, %v2222_v48  ;;  %v2223_v6 = vmax.f32 %v2191_v33, 0.0  ;;  %1795 = vst.msk [vmem:[#allocation3 + $0x80] sm:$0xff] %vm1105_vm15, %v1762_v41  ;;  %v1763_v60 = vadd.f32 %v1686_v53, %v1493_v43  ;;  %v2641_v22 = vpop.f32.mrb[28].mxu0  ;;  %v1826_v1 = vld [vmem:[#allocation3 + $0x78] sm:$0xff]  ;;  %v1502_v33 = vld [vmem:[#allocation3 + $0xd0] sm:$0xff] }
 0x1b7   : > { %2257 = vst.msk [vmem:[%s3381_s6 + $0x38] sm:$0xff] %vm1105_vm15, %v2225_v54  ;;  %1798 = vst.msk [vmem:[#allocation3 + $0x98] sm:$0xff] %vm1105_vm15, %v1765_v59  ;;  %v2094_v27 = vadd.f32 %v2641_v22, %v1825_v30  ;;  %v2001_v62 = vpop.f32.mrb[29].mxu0  ;;  %v1824_v7 = vld [vmem:[#allocation3 + $0x68] sm:$0xff]  ;;  %v1500_v43 = vld [vmem:[#allocation3 + $0xc0] sm:$0xff] }
 0x1b8   : > { %2255 = vst.msk [vmem:[%s3381_s6 + $0x28] sm:$0xff] %vm1105_vm15, %v2223_v6  ;;  %v2157_v46 = vld [vmem:[#allocation3 + $0x50] sm:$0xff]  ;;  %1796 = vst.msk [vmem:[#allocation3 + $0x88] sm:$0xff] %vm1105_vm15, %v1763_v60  ;;  %v2092_v56 = vadd.f32 %v2001_v62, %v1823_v20  ;;  %v2642_v44 = vpop.f32.mrb[30].mxu0  ;;  %v1503_v22 = vld [vmem:[#allocation3 + $0xd8] sm:$0xff] }
 0x1b9   : > { %v2196_v51 = vadd.f32 %v3370_v36, %v2157_v46  ;;  %v2155_v15 = vld [vmem:[#allocation3 + $0x40] sm:$0xff]  ;;  %2126 = vst.msk [vmem:[#allocation3 + $0x70] sm:$0xff] %vm1105_vm15, %v2094_v27  ;;  %v2095_v42 = vadd.f32 %v2642_v44, %v1826_v1  ;;  %v2004_v25 = vpop.f32.mrb[31].mxu0  ;;  %v1501_v46 = vld [vmem:[#allocation3 + $0xc8] sm:$0xff] }
 0x1ba   : > { %v2194_v37 = vadd.f32 %v3370_v36, %v2155_v15  ;;  %v2158_v50 = vld [vmem:[#allocation3 + $0x58] sm:$0xff]  ;;  %2124 = vst.msk [vmem:[#allocation3 + $0x60] sm:$0xff] %vm1105_vm15, %v2092_v56  ;;  %v2093_v0 = vadd.f32 %v2004_v25, %v1824_v7  ;;  %v2615_v23 = vpop.f32.mrb[36].mxu1 }
 0x1bb   : > { %v2228_v21 = vmax.f32 %v2196_v51, 0.0  ;;  %v2197_v47 = vadd.f32 %v3370_v36, %v2158_v50  ;;  %v2156_v31 = vld [vmem:[#allocation3 + $0x48] sm:$0xff]  ;;  %2127 = vst.msk [vmem:[#allocation3 + $0x78] sm:$0xff] %vm1105_vm15, %v2095_v42  ;;  %v1768_v63 = vadd.f32 %v2615_v23, %v1498_v3  ;;  %v1699_v2 = vpop.f32.mrb[37].mxu1 }
 0x1bc   : > { %v2226_v55 = vmax.f32 %v2194_v37, 0.0  ;;  %v2195_v17 = vadd.f32 %v3370_v36, %v2156_v31  ;;  %2125 = vst.msk [vmem:[#allocation3 + $0x68] sm:$0xff] %vm1105_vm15, %v2093_v0  ;;  %v1766_v35 = vadd.f32 %v1699_v2, %v1496_v4  ;;  %v2616_v57 = vpop.f32.mrb[38].mxu1  ;;  %v1829_v8 = vld [vmem:[#allocation3 + $0x90] sm:$0xff] }
 0x1bd   : > { %2260 = vst.msk [vmem:[%s3381_s6 + $0x50] sm:$0xff] %vm1105_vm15, %v2228_v21  ;;  %v2229_v13 = vmax.f32 %v2197_v47, 0.0  ;;  %1801 = vst.msk [vmem:[#allocation3 + $0xb0] sm:$0xff] %vm1105_vm15, %v1768_v63  ;;  %v1769_v49 = vadd.f32 %v2616_v57, %v1499_v45  ;;  %v1702_v16 = vpop.f32.mrb[39].mxu1  ;;  %v1827_v28 = vld [vmem:[#allocation3 + $0x80] sm:$0xff] }
 0x1be   : > { %2258 = vst.msk [vmem:[%s3381_s6 + $0x40] sm:$0xff] %vm1105_vm15, %v2226_v55  ;;  %v2227_v38 = vmax.f32 %v2195_v17, 0.0  ;;  %1799 = vst.msk [vmem:[#allocation3 + $0xa0] sm:$0xff] %vm1105_vm15, %v1766_v35  ;;  %v1767_v52 = vadd.f32 %v1702_v16, %v1497_v18  ;;  %v2645_v26 = vpop.f32.mrb[32].mxu0  ;;  %v1830_v10 = vld [vmem:[#allocation3 + $0x98] sm:$0xff]  ;;  %v1506_v17 = vld [vmem:[#allocation3 + $0xf0] sm:$0xff] }
 0x1bf   : > { %2261 = vst.msk [vmem:[%s3381_s6 + $0x58] sm:$0xff] %vm1105_vm15, %v2229_v13  ;;  %1802 = vst.msk [vmem:[#allocation3 + $0xb8] sm:$0xff] %vm1105_vm15, %v1769_v49  ;;  %v2098_v32 = vadd.f32 %v2645_v26, %v1829_v8  ;;  %v2017_v9 = vpop.f32.mrb[33].mxu0  ;;  %v1828_v5 = vld [vmem:[#allocation3 + $0x88] sm:$0xff]  ;;  %v1504_v18 = vld [vmem:[#allocation3 + $0xe0] sm:$0xff] }
 0x1c0   : > { %2259 = vst.msk [vmem:[%s3381_s6 + $0x48] sm:$0xff] %vm1105_vm15, %v2227_v38  ;;  %v2161_v29 = vld [vmem:[#allocation3 + $0x70] sm:$0xff]  ;;  %1800 = vst.msk [vmem:[#allocation3 + $0xa8] sm:$0xff] %vm1105_vm15, %v1767_v52  ;;  %v2096_v61 = vadd.f32 %v2017_v9, %v1827_v28  ;;  %v2646_v39 = vpop.f32.mrb[34].mxu0  ;;  %v1507_v26 = vld [vmem:[#allocation3 + $0xf8] sm:$0xff] }
 0x1c1   : > { %v2200_v34 = vadd.f32 %v3370_v36, %v2161_v29  ;;  %v2159_v58 = vld [vmem:[#allocation3 + $0x60] sm:$0xff]  ;;  %2130 = vst.msk [vmem:[#allocation3 + $0x90] sm:$0xff] %vm1105_vm15, %v2098_v32  ;;  %v2099_v40 = vadd.f32 %v2646_v39, %v1830_v10  ;;  %v2020_v11 = vpop.f32.mrb[35].mxu0  ;;  %v1505_v29 = vld [vmem:[#allocation3 + $0xe8] sm:$0xff] }
 0x1c2   : > { %v2198_v12 = vadd.f32 %v3370_v36, %v2159_v58  ;;  %v2162_v24 = vld [vmem:[#allocation3 + $0x78] sm:$0xff]  ;;  %2128 = vst.msk [vmem:[#allocation3 + $0x80] sm:$0xff] %vm1105_vm15, %v2096_v61  ;;  %v2097_v48 = vadd.f32 %v2020_v11, %v1828_v5  ;;  %v2619_v41 = vpop.f32.mrb[40].mxu1 }
 0x1c3   : > { %v2232_v14 = vmax.f32 %v2200_v34, 0.0  ;;  %v2201_v19 = vadd.f32 %v3370_v36, %v2162_v24  ;;  %v2160_v54 = vld [vmem:[#allocation3 + $0x68] sm:$0xff]  ;;  %2131 = vst.msk [vmem:[#allocation3 + $0x98] sm:$0xff] %vm1105_vm15, %v2099_v40  ;;  %v1772_v59 = vadd.f32 %v2619_v41, %v1502_v33  ;;  %v1715_v53 = vpop.f32.mrb[41].mxu1 }
 0x1c4   : > { %v2230_v6 = vmax.f32 %v2198_v12, 0.0  ;;  %v2199_v60 = vadd.f32 %v3370_v36, %v2160_v54  ;;  %2129 = vst.msk [vmem:[#allocation3 + $0x88] sm:$0xff] %vm1105_vm15, %v2097_v48  ;;  %v1770_v30 = vadd.f32 %v1715_v53, %v1500_v43  ;;  %v2620_v27 = vpop.f32.mrb[42].mxu1  ;;  %v1833_v51 = vld [vmem:[#allocation3 + $0xb0] sm:$0xff] }
 0x1c5   : > { %2264 = vst.msk [vmem:[%s3381_s6 + $0x70] sm:$0xff] %vm1105_vm15, %v2232_v14  ;;  %v2233_v20 = vmax.f32 %v2201_v19, 0.0  ;;  %1805 = vst.msk [vmem:[#allocation3 + $0xd0] sm:$0xff] %vm1105_vm15, %v1772_v59  ;;  %v1773_v62 = vadd.f32 %v2620_v27, %v1503_v22  ;;  %v1718_v56 = vpop.f32.mrb[43].mxu1  ;;  %v1831_v7 = vld [vmem:[#allocation3 + $0xa0] sm:$0xff] }
 0x1c6   : > { %2262 = vst.msk [vmem:[%s3381_s6 + $0x60] sm:$0xff] %vm1105_vm15, %v2230_v6  ;;  %v2231_v1 = vmax.f32 %v2199_v60, 0.0  ;;  %1803 = vst.msk [vmem:[#allocation3 + $0xc0] sm:$0xff] %vm1105_vm15, %v1770_v30  ;;  %v1771_v44 = vadd.f32 %v1718_v56, %v1501_v46  ;;  %v2649_v15 = vpop.f32.mrb[36].mxu0  ;;  %v1834_v0 = vld [vmem:[#allocation3 + $0xb8] sm:$0xff] }
 0x1c7   : > { %2265 = vst.msk [vmem:[%s3381_s6 + $0x78] sm:$0xff] %vm1105_vm15, %v2233_v20  ;;  %1806 = vst.msk [vmem:[#allocation3 + $0xd8] sm:$0xff] %vm1105_vm15, %v1773_v62  ;;  %v2102_v42 = vadd.f32 %v2649_v15, %v1833_v51  ;;  %v2033_v25 = vpop.f32.mrb[37].mxu0  ;;  %v1832_v31 = vld [vmem:[#allocation3 + $0xa8] sm:$0xff] }
 0x1c8   : > { %2263 = vst.msk [vmem:[%s3381_s6 + $0x68] sm:$0xff] %vm1105_vm15, %v2231_v1  ;;  %v2165_v37 = vld [vmem:[#allocation3 + $0x90] sm:$0xff]  ;;  %1804 = vst.msk [vmem:[#allocation3 + $0xc8] sm:$0xff] %vm1105_vm15, %v1771_v44  ;;  %v2100_v50 = vadd.f32 %v2033_v25, %v1831_v7  ;;  %v2650_v3 = vpop.f32.mrb[38].mxu0 }
 0x1c9   : > { %v2204_v23 = vadd.f32 %v3370_v36, %v2165_v37  ;;  %v2163_v21 = vld [vmem:[#allocation3 + $0x80] sm:$0xff]  ;;  %2134 = vst.msk [vmem:[#allocation3 + $0xb0] sm:$0xff] %vm1105_vm15, %v2102_v42  ;;  %v2103_v47 = vadd.f32 %v2650_v3, %v1834_v0  ;;  %v2036_v63 = vpop.f32.mrb[39].mxu0 }
 0x1ca   : > { %v2202_v4 = vadd.f32 %v3370_v36, %v2163_v21  ;;  %v2166_v2 = vld [vmem:[#allocation3 + $0x98] sm:$0xff]  ;;  %2132 = vst.msk [vmem:[#allocation3 + $0xa0] sm:$0xff] %vm1105_vm15, %v2100_v50  ;;  %v2101_v55 = vadd.f32 %v2036_v63, %v1832_v31  ;;  %v2623_v35 = vpop.f32.mrb[44].mxu1 }
 0x1cb   : > { %v2236_v45 = vmax.f32 %v2204_v23, 0.0  ;;  %v2205_v57 = vadd.f32 %v3370_v36, %v2166_v2  ;;  %v2164_v13 = vld [vmem:[#allocation3 + $0x88] sm:$0xff]  ;;  %2135 = vst.msk [vmem:[#allocation3 + $0xb8] sm:$0xff] %vm1105_vm15, %v2103_v47  ;;  %v1776_v49 = vadd.f32 %v2623_v35, %v1506_v17  ;;  %v1731_v16 = vpop.f32.mrb[45].mxu1 }
 0x1cc   : > { %v2234_v38 = vmax.f32 %v2202_v4, 0.0  ;;  %v2203_v52 = vadd.f32 %v3370_v36, %v2164_v13  ;;  %2133 = vst.msk [vmem:[#allocation3 + $0xa8] sm:$0xff] %vm1105_vm15, %v2101_v55  ;;  %v1774_v8 = vadd.f32 %v1731_v16, %v1504_v18  ;;  %v2624_v32 = vpop.f32.mrb[46].mxu1  ;;  %v1837_v34 = vld [vmem:[#allocation3 + $0xd0] sm:$0xff] }
 0x1cd   : > { %2268 = vst.msk [vmem:[%s3381_s6 + $0x90] sm:$0xff] %vm1105_vm15, %v2236_v45  ;;  %v2237_v28 = vmax.f32 %v2205_v57, 0.0  ;;  %1809 = vst.msk [vmem:[#allocation3 + $0xf0] sm:$0xff] %vm1105_vm15, %v1776_v49  ;;  %v1777_v9 = vadd.f32 %v2624_v32, %v1507_v26  ;;  %v1734_v61 = vpop.f32.mrb[47].mxu1  ;;  %v1835_v5 = vld [vmem:[#allocation3 + $0xc0] sm:$0xff] }
 0x1ce   : > { %2266 = vst.msk [vmem:[%s3381_s6 + $0x80] sm:$0xff] %vm1105_vm15, %v2234_v38  ;;  %v2235_v10 = vmax.f32 %v2203_v52, 0.0  ;;  %1807 = vst.msk [vmem:[#allocation3 + $0xe0] sm:$0xff] %vm1105_vm15, %v1774_v8  ;;  %v1775_v39 = vadd.f32 %v1734_v61, %v1505_v29  ;;  %v2653_v58 = vpop.f32.mrb[40].mxu0  ;;  %v1838_v48 = vld [vmem:[#allocation3 + $0xd8] sm:$0xff] }
 0x1cf   : > { %2269 = vst.msk [vmem:[%s3381_s6 + $0x98] sm:$0xff] %vm1105_vm15, %v2237_v28  ;;  %1810 = vst.msk [vmem:[#allocation3 + $0xf8] sm:$0xff] %vm1105_vm15, %v1777_v9  ;;  %v2106_v40 = vadd.f32 %v2653_v58, %v1837_v34  ;;  %v2049_v11 = vpop.f32.mrb[41].mxu0  ;;  %v1836_v54 = vld [vmem:[#allocation3 + $0xc8] sm:$0xff] }
 0x1d0   : > { %2267 = vst.msk [vmem:[%s3381_s6 + $0x88] sm:$0xff] %vm1105_vm15, %v2235_v10  ;;  %v2169_v12 = vld [vmem:[#allocation3 + $0xb0] sm:$0xff]  ;;  %1808 = vst.msk [vmem:[#allocation3 + $0xe8] sm:$0xff] %vm1105_vm15, %v1775_v39  ;;  %v2104_v24 = vadd.f32 %v2049_v11, %v1835_v5  ;;  %v2654_v33 = vpop.f32.mrb[42].mxu0 }
 0x1d1   : > { %v2208_v41 = vadd.f32 %v3370_v36, %v2169_v12  ;;  %v2167_v14 = vld [vmem:[#allocation3 + $0xa0] sm:$0xff]  ;;  %2138 = vst.msk [vmem:[#allocation3 + $0xd0] sm:$0xff] %vm1105_vm15, %v2106_v40  ;;  %v2107_v19 = vadd.f32 %v2654_v33, %v1838_v48  ;;  %v2052_v59 = vpop.f32.mrb[43].mxu0 }
 0x1d2   : > { %v2206_v43 = vadd.f32 %v3370_v36, %v2167_v14  ;;  %v2170_v53 = vld [vmem:[#allocation3 + $0xb8] sm:$0xff]  ;;  %2136 = vst.msk [vmem:[#allocation3 + $0xc0] sm:$0xff] %vm1105_vm15, %v2104_v24  ;;  %v2105_v6 = vadd.f32 %v2052_v59, %v1836_v54 }
 0x1d3   : > { %v2240_v60 = vmax.f32 %v2208_v41, 0.0  ;;  %v2209_v30 = vadd.f32 %v3370_v36, %v2170_v53  ;;  %v2168_v22 = vld [vmem:[#allocation3 + $0xa8] sm:$0xff]  ;;  %2139 = vst.msk [vmem:[#allocation3 + $0xd8] sm:$0xff] %vm1105_vm15, %v2107_v19 }
 0x1d4   : > { %v2238_v27 = vmax.f32 %v2206_v43, 0.0  ;;  %v2207_v20 = vadd.f32 %v3370_v36, %v2168_v22  ;;  %2137 = vst.msk [vmem:[#allocation3 + $0xc8] sm:$0xff] %vm1105_vm15, %v2105_v6  ;;  %v1841_v56 = vld [vmem:[#allocation3 + $0xf0] sm:$0xff] }
 0x1d5   : > { %2272 = vst.msk [vmem:[%s3381_s6 + $0xb0] sm:$0xff] %vm1105_vm15, %v2240_v60  ;;  %v2241_v62 = vmax.f32 %v2209_v30, 0.0  ;;  %v1839_v51 = vld [vmem:[#allocation3 + $0xe0] sm:$0xff] }
 0x1d6   : > { %2270 = vst.msk [vmem:[%s3381_s6 + $0xa0] sm:$0xff] %vm1105_vm15, %v2238_v27  ;;  %v2239_v46 = vmax.f32 %v2207_v20, 0.0  ;;  %v2657_v1 = vpop.f32.mrb[44].mxu0  ;;  %v1842_v25 = vld [vmem:[#allocation3 + $0xf8] sm:$0xff] }
 0x1d7   : > { %2273 = vst.msk [vmem:[%s3381_s6 + $0xb8] sm:$0xff] %vm1105_vm15, %v2241_v62  ;;  %v2110_v44 = vadd.f32 %v2657_v1, %v1841_v56  ;;  %v2065_v15 = vpop.f32.mrb[45].mxu0  ;;  %v1840_v23 = vld [vmem:[#allocation3 + $0xe8] sm:$0xff] }
 0x1d8   : > { %2271 = vst.msk [vmem:[%s3381_s6 + $0xa8] sm:$0xff] %vm1105_vm15, %v2239_v46  ;;  %v2173_v42 = vld [vmem:[#allocation3 + $0xd0] sm:$0xff]  ;;  %v2108_v7 = vadd.f32 %v2065_v15, %v1839_v51  ;;  %v2658_v37 = vpop.f32.mrb[46].mxu0 }
 0x1d9   : > { %v2212_v50 = vadd.f32 %v3370_v36, %v2173_v42  ;;  %v2171_v0 = vld [vmem:[#allocation3 + $0xc0] sm:$0xff]  ;;  %2142 = vst.msk [vmem:[#allocation3 + $0xf0] sm:$0xff] %vm1105_vm15, %v2110_v44  ;;  %v2111_v3 = vadd.f32 %v2658_v37, %v1842_v25  ;;  %v2068_v21 = vpop.f32.mrb[47].mxu0 }
 0x1da   : > { %v2210_v47 = vadd.f32 %v3370_v36, %v2171_v0  ;;  %v2174_v31 = vld [vmem:[#allocation3 + $0xd8] sm:$0xff]  ;;  %2140 = vst.msk [vmem:[#allocation3 + $0xe0] sm:$0xff] %vm1105_vm15, %v2108_v7  ;;  %v2109_v63 = vadd.f32 %v2068_v21, %v1840_v23 }
 0x1db   : > { %v2244_v4 = vmax.f32 %v2212_v50, 0.0  ;;  %v2213_v2 = vadd.f32 %v3370_v36, %v2174_v31  ;;  %v2172_v55 = vld [vmem:[#allocation3 + $0xc8] sm:$0xff]  ;;  %2143 = vst.msk [vmem:[#allocation3 + $0xf8] sm:$0xff] %vm1105_vm15, %v2111_v3 }
 0x1dc   : > { %v2242_v17 = vmax.f32 %v2210_v47, 0.0  ;;  %v2211_v35 = vadd.f32 %v3370_v36, %v2172_v55  ;;  %2141 = vst.msk [vmem:[#allocation3 + $0xe8] sm:$0xff] %vm1105_vm15, %v2109_v63 }
 0x1dd   : > { %2276 = vst.msk [vmem:[%s3381_s6 + $0xd0] sm:$0xff] %vm1105_vm15, %v2244_v4  ;;  %v2245_v45 = vmax.f32 %v2213_v2, 0.0 }
 0x1de   : > { %2274 = vst.msk [vmem:[%s3381_s6 + $0xc0] sm:$0xff] %vm1105_vm15, %v2242_v17  ;;  %v2243_v57 = vmax.f32 %v2211_v35, 0.0 }
 0x1df   : > { %2277 = vst.msk [vmem:[%s3381_s6 + $0xd8] sm:$0xff] %vm1105_vm15, %v2245_v45 }
 0x1e0   : > { %2275 = vst.msk [vmem:[%s3381_s6 + $0xc8] sm:$0xff] %vm1105_vm15, %v2243_v57  ;;  %v2177_v13 = vld [vmem:[#allocation3 + $0xf0] sm:$0xff] }
 0x1e1   : > { %v2216_v49 = vadd.f32 %v3370_v36, %v2177_v13  ;;  %v2175_v18 = vld [vmem:[#allocation3 + $0xe0] sm:$0xff] }
 0x1e2   : > { %v2214_v16 = vadd.f32 %v3370_v36, %v2175_v18  ;;  %v2178_v38 = vld [vmem:[#allocation3 + $0xf8] sm:$0xff] }
 0x1e3   : > { %v2248_v52 = vmax.f32 %v2216_v49, 0.0  ;;  %v2217_v8 = vadd.f32 %v3370_v36, %v2178_v38  ;;  %v2176_v26 = vld [vmem:[#allocation3 + $0xe8] sm:$0xff] }
 0x1e4   : > { %v2246_v32 = vmax.f32 %v2214_v16, 0.0  ;;  %v2215_v28 = vadd.f32 %v3370_v36, %v2176_v26 }
 0x1e5   : > { %2280 = vst.msk [vmem:[%s3381_s6 + $0xf0] sm:$0xff] %vm1105_vm15, %v2248_v52  ;;  %v2249_v9 = vmax.f32 %v2217_v8, 0.0 }
 0x1e6   : > { %2278 = vst.msk [vmem:[%s3381_s6 + $0xe0] sm:$0xff] %vm1105_vm15, %v2246_v32  ;;  %v2247_v29 = vmax.f32 %v2215_v28, 0.0 }
 0x1e7   : > { %2281 = vst.msk [vmem:[%s3381_s6 + $0xf8] sm:$0xff] %vm1105_vm15, %v2249_v9 }
 0x1e8   : > { %2279 = vst.msk [vmem:[%s3381_s6 + $0xe8] sm:$0xff] %vm1105_vm15, %v2247_v29 }
 0x1e9 PF: > { %s13_s14 = sadd.s32 1, %s2733_s14   ;;  %s3562_s12 = smov %s2729_s13 }
 0x1ea   : > { %p10_p5 = scmp.ge.s32.totalorder %s13_s14, 4   ;;  %s3563_s13 = smov %s3565_s15 }
 0x1ec   :  { %12 = sbr.rel (!%p10_p5) target bundleno = 2 (0x2), region = 89 }

</bundles_post_ra>
